<compile_context>
chip_gen: v7x
topology: tpu7x:2x2x1
jax: 0.10.0
libtpu: 0.0.40
codegen_flags: <defaults>
</compile_context>

<pallas_src>
import functools

import jax
import jax.numpy as jnp
from jax.experimental import pallas as pl
from jax.experimental.pallas import tpu as pltpu


def _round_up(x, m):
    return (x + m - 1) // m * m


def _pad_axis(a, axis, target):
    pad = target - a.shape[axis]
    if pad == 0:
        return a
    widths = [(0, 0)] * a.ndim
    widths[axis] = (0, pad)
    return jnp.pad(a, widths)


def _default_row_tile():
    # v5e's MXU is 4x128x128 -> 128 rows already saturate it; v6e/v7x want 256+.
    try:
        kind = jax.devices()[0].device_kind.lower()
        if "v5 lite" in kind or "v5lite" in kind or "v5e" in kind:
            return 128
    except Exception:
        pass
    return 256


def _softmoe_kernel(m_total,
                    x_ref, wg1_ref, bg1_ref, wg2_ref, bg2_ref,
                    w1_ref, b1_ref, w2_ref, b2_ref,
                    out_ref, gsum_ref, gate_ref):
    """Grid = (token_tiles, num_experts).  Step (i, e) applies expert e to the
    i-th (tm, D) token tile and accumulates into the resident output block."""
    # Program ids MUST be read at the top level of the body (never inside a
    # pl.when branch): inside lax.cond they are neither grid-substituted in
    # interpret mode nor lowerable on CPU.
    i = pl.program_id(0)
    e = pl.program_id(1)
    tm = x_ref.shape[0]
    n_exp = gate_ref.shape[1]
    row_base = i * tm

    x = x_ref[...]                                               # (tm, Dp) bf16, resident over e

    # ---- gating network: Linear -> ReLU -> Linear -> softmax (once per tile).
    @pl.when(e == 0)
    def _gate():
        gh = jnp.dot(x, wg1_ref[...], preferred_element_type=jnp.float32)
        gh = jnp.maximum(gh + bg1_ref[...], 0.0)
        logits = jnp.dot(gh.astype(jnp.bfloat16), wg2_ref[...],
                         preferred_element_type=jnp.float32) + bg2_ref[...]
        logits = logits - jnp.max(logits, axis=-1, keepdims=True)
        eg = jnp.exp(logits)
        gate = eg / jnp.sum(eg, axis=-1, keepdims=True)
        gate_ref[...] = gate                                     # carried across expert steps

        # In-kernel reduction of gate stats for the capacity loss (avoids an
        # (M, E) HBM write stream).  Padded rows are masked out.
        row = row_base + jax.lax.broadcasted_iota(jnp.int32, (tm, 1), 0)
        tile_sum = jnp.sum(jnp.where(row < m_total, gate, 0.0), axis=0, keepdims=True)
        sub = jax.lax.broadcasted_iota(jnp.int32, (8, n_exp), 0)
        gsum_ref[...] = jnp.where(sub == 0, tile_sum, 0.0)

    # ---- expert e: Linear -> ReLU -> Linear (bf16 matmuls, f32 accumulate).
    h = jnp.dot(x, w1_ref[...], preferred_element_type=jnp.float32)
    h = jnp.maximum(h + b1_ref[...], 0.0)
    ye = jnp.dot(h.astype(jnp.bfloat16), w2_ref[...],
                 preferred_element_type=jnp.float32) + b2_ref[...]

    # Gate column for this expert, (tm, 1), via a one-hot lane reduction (no
    # dynamic lane indexing).
    onehot = (jax.lax.broadcasted_iota(jnp.int32, (1, n_exp), 1) == e).astype(jnp.float32)
    gate_col = jnp.sum(gate_ref[...] * onehot, axis=-1, keepdims=True)

    @pl.when(e == 0)
    def _init():
        out_ref[...] = gate_col * ye

    @pl.when(e != 0)
    def _accumulate():
        out_ref[...] = out_ref[...] + gate_col * ye


def softmoe_forward(x, params, *, num_experts, loss_coef=0.01, tm=None):
    """x: (B, N, D) float32.  Returns (output (B, N, D) f32, capacity_loss scalar)."""
    B, N, D = x.shape
    E = num_experts
    M = B * N

    wg1, bg1, wg2, bg2 = params["wg1"], params["bg1"], params["wg2"], params["bg2"]
    w1, b1, w2, b2 = params["w1"], params["b1"], params["w2"], params["b2"]
    Gh = wg1.shape[1]
    H = w1.shape[2]

    if tm is None:
        tm = _default_row_tile()
    tm = min(tm, _round_up(M, 8))          # don't over-tile tiny inputs
    Mp = _round_up(M, tm)
    Dp = _round_up(D, 128)                 # lane-dense output block
    Ghp = _round_up(Gh, 128)
    Hp = _round_up(H, 128)
    n_tiles = Mp // tm

    # Zero-pad to tile-friendly sizes (mathematically inert for
    # Linear->ReLU->Linear with zero-padded weights/biases) and cast all
    # matmul operands to bf16; biases stay f32.
    x2 = _pad_axis(_pad_axis(x.reshape(M, D), 0, Mp), 1, Dp).astype(jnp.bfloat16)
    wg1p = _pad_axis(_pad_axis(wg1, 0, Dp), 1, Ghp).astype(jnp.bfloat16)
    bg1p = _pad_axis(bg1, 0, Ghp).reshape(1, Ghp).astype(jnp.float32)
    wg2p = _pad_axis(wg2, 0, Ghp).astype(jnp.bfloat16)
    bg2p = bg2.reshape(1, E).astype(jnp.float32)
    w1p = _pad_axis(_pad_axis(w1, 1, Dp), 2, Hp).astype(jnp.bfloat16)
    b1p = _pad_axis(b1, 1, Hp).reshape(E, 1, Hp).astype(jnp.float32)
    w2p = _pad_axis(_pad_axis(w2, 1, Hp), 2, Dp).astype(jnp.bfloat16)
    b2p = _pad_axis(b2, 1, Dp).reshape(E, 1, Dp).astype(jnp.float32)

    const = lambda shape: pl.BlockSpec(shape, lambda i, e, _s=shape: (0,) * len(_s))

    kernel = functools.partial(_softmoe_kernel, M)
    out2, gsum = pl.pallas_call(
        kernel,
        out_shape=(jax.ShapeDtypeStruct((Mp, Dp), jnp.float32),
                   jax.ShapeDtypeStruct((n_tiles * 8, E), jnp.float32)),
        grid_spec=pltpu.PrefetchScalarGridSpec(
            num_scalar_prefetch=0,
            grid=(n_tiles, E),
            in_specs=[
                pl.BlockSpec((tm, Dp), lambda i, e: (i, 0)),            # x tile (resident over e)
                const((Dp, Ghp)),                                       # gating W1 (const)
                const((1, Ghp)),                                        # gating b1
                const((Ghp, E)),                                        # gating W2
                const((1, E)),                                          # gating b2
                pl.BlockSpec((None, Dp, Hp), lambda i, e: (e, 0, 0)),   # expert W1 (streamed per e)
                pl.BlockSpec((None, 1, Hp), lambda i, e: (e, 0, 0)),    # expert b1 (streamed per e)
                pl.BlockSpec((None, Hp, Dp), lambda i, e: (e, 0, 0)),   # expert W2 (streamed per e)
                pl.BlockSpec((None, 1, Dp), lambda i, e: (e, 0, 0)),    # expert b2 (streamed per e)
            ],
            out_specs=(
                pl.BlockSpec((tm, Dp), lambda i, e: (i, 0)),            # combined output (accumulated over e)
                pl.BlockSpec((8, E), lambda i, e: (i, 0)),              # per-tile gate sums
            ),
            scratch_shapes=[pltpu.VMEM((tm, E), jnp.float32)],          # gate, carried across expert steps
        ),
        compiler_params=pltpu.CompilerParams(
            dimension_semantics=("parallel", "arbitrary"),
            vmem_limit_bytes=64 * 1024 * 1024),
    )(x2, wg1p, bg1p, wg2p, bg2p, w1p, b1p, w2p, b2p)

    output = out2[:M, :D].reshape(B, N, D)
    mean_weights = jnp.sum(gsum, axis=0) / M
    capacity_loss = jnp.sum(mean_weights ** 2) * loss_coef
    # TODO(synk): top_k != 0 gating path (topk + scatter to -inf before softmax) not implemented.
    return output, capacity_loss


def init_params(key, input_dim, num_experts, hidden_dim=None, gating_hidden_dim=None):
    hidden_dim = hidden_dim if hidden_dim is not None else input_dim * 4
    gating_hidden_dim = (gating_hidden_dim if gating_hidden_dim is not None
                         else input_dim * 2)
    ks = jax.random.split(key, 8)
    scale = 0.05
    return {
        "wg1": scale * jax.random.normal(ks[0], (input_dim, gating_hidden_dim), jnp.float32),
        "bg1": scale * jax.random.normal(ks[1], (gating_hidden_dim,), jnp.float32),
        "wg2": scale * jax.random.normal(ks[2], (gating_hidden_dim, num_experts), jnp.float32),
        "bg2": scale * jax.random.normal(ks[3], (num_experts,), jnp.float32),
        "w1": scale * jax.random.normal(ks[4], (num_experts, input_dim, hidden_dim), jnp.float32),
        "b1": scale * jax.random.normal(ks[5], (num_experts, hidden_dim), jnp.float32),
        "w2": scale * jax.random.normal(ks[6], (num_experts, hidden_dim, input_dim), jnp.float32),
        "b2": scale * jax.random.normal(ks[7], (num_experts, input_dim), jnp.float32),
    }


def _reference(x, params, num_experts, loss_coef=0.01):
    """Pure-JAX f32 reference mirroring the PyTorch forward (top_k=0)."""
    gh = jax.nn.relu(x @ params["wg1"] + params["bg1"])
    logits = gh @ params["wg2"] + params["bg2"]
    gate = jax.nn.softmax(logits, axis=-1)                       # (B, N, E)
    outs = []
    for e in range(num_experts):
        h = jax.nn.relu(x @ params["w1"][e] + params["b1"][e])
        outs.append(h @ params["w2"][e] + params["b2"][e])
    expert_outputs = jnp.stack(outs, axis=2)                     # (B, N, E, D)
    output = jnp.einsum("bned,bne->bnd", expert_outputs, gate)
    mean_weights = gate.reshape(-1, num_experts).mean(axis=0)
    return output, jnp.sum(mean_weights ** 2) * loss_coef


if __name__ == "__main__":
    B, N, D = 2, 8, 128          # D multiple of 128 -> lane-dense output block
    num_experts = 4
    loss_coef = 0.01

    key = jax.random.PRNGKey(0)
    kx, kp = jax.random.split(key)
    x = jax.random.normal(kx, (B, N, D), jnp.float32)
    params = init_params(kp, D, num_experts)     # H = 4D = 512, Gh = 2D = 256

    out, cap_loss = softmoe_forward(x, params, num_experts=num_experts,
                                    loss_coef=loss_coef)
    out = jax.block_until_ready(out)
    cap_loss = jax.block_until_ready(cap_loss)

    ref_out, ref_loss = _reference(x, params, num_experts, loss_coef)
    # bf16 matmuls with f32 accumulation -> loosened tolerance vs the f32 reference.
    assert jnp.allclose(out, ref_out, atol=3e-2, rtol=3e-2), (
        float(jnp.max(jnp.abs(out - ref_out))))
    assert jnp.allclose(cap_loss, ref_loss, rtol=3e-2, atol=1e-6), (
        float(cap_loss), float(ref_loss))

    print("KERNEL_OK")
</pallas_src>

<mosaic_0001>
module attributes {stable_mosaic.version = 11 : i64} {
  func.func @_softmoe_kernel(%arg0: i32, %arg1: i32, %arg2: memref<16x128xbf16, #tpu.memory_space<vmem>>, %arg3: memref<128x256xbf16, #tpu.memory_space<vmem>>, %arg4: memref<1x256xf32, #tpu.memory_space<vmem>>, %arg5: memref<256x4xbf16, #tpu.memory_space<vmem>>, %arg6: memref<1x4xf32, #tpu.memory_space<vmem>>, %arg7: memref<1x128x512xbf16, #tpu.memory_space<vmem>>, %arg8: memref<1x1x512xf32, #tpu.memory_space<vmem>>, %arg9: memref<1x512x128xbf16, #tpu.memory_space<vmem>>, %arg10: memref<1x1x128xf32, #tpu.memory_space<vmem>>, %arg11: memref<16x128xf32, #tpu.memory_space<vmem>>, %arg12: memref<8x4xf32, #tpu.memory_space<vmem>>, %arg13: memref<16x4xf32, #tpu.memory_space<vmem>>) attributes {dimension_semantics = [#tpu.dimension_semantics<parallel>, #tpu.dimension_semantics<arbitrary>], iteration_bounds = array<i64: 1, 4>, scalar_prefetch = 0 : i64, scratch_operands = 1 : i64, tpu.core_type = #tpu.core_type<tc>, window_params = [{transform_indices = @transform_0, window_bounds = array<i64: 16, 128>}, {pipeline_mode = #tpu.pipeline_mode<synchronous>, transform_indices = @transform_1, window_bounds = array<i64: 128, 256>}, {pipeline_mode = #tpu.pipeline_mode<synchronous>, transform_indices = @transform_2, window_bounds = array<i64: 1, 256>}, {pipeline_mode = #tpu.pipeline_mode<synchronous>, transform_indices = @transform_3, window_bounds = array<i64: 256, 4>}, {pipeline_mode = #tpu.pipeline_mode<synchronous>, transform_indices = @transform_4, window_bounds = array<i64: 1, 4>}, {transform_indices = @transform_5, window_bounds = array<i64: 1, 128, 512>}, {transform_indices = @transform_6, window_bounds = array<i64: 1, 1, 512>}, {transform_indices = @transform_7, window_bounds = array<i64: 1, 512, 128>}, {transform_indices = @transform_8, window_bounds = array<i64: 1, 1, 128>}, {transform_indices = @transform_9, window_bounds = array<i64: 16, 128>}, {transform_indices = @transform_10, window_bounds = array<i64: 8, 4>}]} {
    %c16_i32 = arith.constant 16 : i32
    %0 = arith.muli %arg0, %c16_i32 : i32
    %c0 = arith.constant 0 : index
    %c0_0 = arith.constant 0 : index
    %1 = vector.load %arg2[%c0, %c0_0] : memref<16x128xbf16, #tpu.memory_space<vmem>>, vector<16x128xbf16>
    %c0_i32 = arith.constant 0 : i32
    %2 = arith.cmpi eq, %arg1, %c0_i32 : i32
    %3 = arith.extui %2 : i1 to i32
    %c0_i32_1 = arith.constant 0 : i32
    %4 = arith.cmpi ne, %3, %c0_i32_1 : i32
    scf.if %4 {
      %c0_23 = arith.constant 0 : index
      %c0_24 = arith.constant 0 : index
      %38 = vector.load %arg3[%c0_23, %c0_24] : memref<128x256xbf16, #tpu.memory_space<vmem>>, vector<128x256xbf16>
      %cst_25 = arith.constant dense<0.000000e+00> : vector<16x256xf32>
      %39 = tpu.matmul %1, %38, %cst_25 {dimension_numbers = #tpu.dot_dimension_numbers<[1], [0], [0], [1], [0, 0, 1, 1], [], []>} : vector<16x128xbf16>, vector<128x256xbf16>, vector<16x256xf32> -> vector<16x256xf32>
      %c0_26 = arith.constant 0 : index
      %c0_27 = arith.constant 0 : index
      %40 = vector.load %arg4[%c0_26, %c0_27] : memref<1x256xf32, #tpu.memory_space<vmem>>, vector<1x256xf32>
      %41 = vector.broadcast %40 : vector<1x256xf32> to vector<16x256xf32>
      %42 = arith.addf %39, %41 : vector<16x256xf32>
      %cst_28 = arith.constant 0.000000e+00 : f32
      %43 = vector.broadcast %cst_28 : f32 to vector<16x256xf32>
      %44 = arith.maximumf %42, %43 : vector<16x256xf32>
      %45 = arith.truncf %44 : vector<16x256xf32> to vector<16x256xbf16>
      %c0_29 = arith.constant 0 : index
      %c0_30 = arith.constant 0 : index
      %46 = vector.load %arg5[%c0_29, %c0_30] : memref<256x4xbf16, #tpu.memory_space<vmem>>, vector<256x4xbf16>
      %cst_31 = arith.constant dense<0.000000e+00> : vector<16x4xf32>
      %47 = tpu.matmul %45, %46, %cst_31 {dimension_numbers = #tpu.dot_dimension_numbers<[1], [0], [0], [1], [0, 0, 1, 1], [], []>} : vector<16x256xbf16>, vector<256x4xbf16>, vector<16x4xf32> -> vector<16x4xf32>
      %c0_32 = arith.constant 0 : index
      %c0_33 = arith.constant 0 : index
      %48 = vector.load %arg6[%c0_32, %c0_33] : memref<1x4xf32, #tpu.memory_space<vmem>>, vector<1x4xf32>
      %49 = vector.broadcast %48 : vector<1x4xf32> to vector<16x4xf32>
      %50 = arith.addf %47, %49 : vector<16x4xf32>
      %cst_34 = arith.constant dense<0xFF800000> : vector<16xf32>
      %51 = vector.multi_reduction <maximumf>, %50, %cst_34 [1] : vector<16x4xf32> to vector<16xf32>
      %52 = vector.shape_cast %51 : vector<16xf32> to vector<16x1xf32>
      %53 = vector.broadcast %52 : vector<16x1xf32> to vector<16x4xf32>
      %54 = arith.subf %50, %53 : vector<16x4xf32>
      %55 = math.exp %54 : vector<16x4xf32>
      %cst_35 = arith.constant dense<0.000000e+00> : vector<16xf32>
      %56 = vector.multi_reduction <add>, %55, %cst_35 [1] : vector<16x4xf32> to vector<16xf32>
      %57 = vector.shape_cast %56 : vector<16xf32> to vector<16x1xf32>
      %58 = vector.broadcast %57 : vector<16x1xf32> to vector<16x4xf32>
      %59 = arith.divf %55, %58 : vector<16x4xf32>
      %c0_36 = arith.constant 0 : index
      %c0_37 = arith.constant 0 : index
      %60 = vector.load %arg13[%c0_36, %c0_37] : memref<16x4xf32, #tpu.memory_space<vmem>>, vector<16x4xf32>
      tpu.vector_store %arg13[%c0_36, %c0_37], %59 {strides = array<i32>} : memref<16x4xf32, #tpu.memory_space<vmem>>, vector<16x4xf32>,
      %61 = tpu.iota {dimensions = array<i32: 0>} : vector<16x1xi32>
      %62 = vector.broadcast %0 : i32 to vector<16x1xi32>
      %63 = arith.addi %62, %61 : vector<16x1xi32>
      %c16_i32_38 = arith.constant 16 : i32
      %64 = vector.broadcast %c16_i32_38 : i32 to vector<16x1xi32>
      %65 = arith.cmpi slt, %63, %64 : vector<16x1xi32>
      %cst_39 = arith.constant 0.000000e+00 : f32
      %66 = vector.shape_cast %65 : vector<16x1xi1> to vector<16x1xi1>
      %67 = vector.broadcast %66 : vector<16x1xi1> to vector<16x4xi1>
      %68 = vector.broadcast %cst_39 : f32 to vector<16x4xf32>
      %69 = arith.select %67, %59, %68 : vector<16x4xi1>, vector<16x4xf32>
      %cst_40 = arith.constant dense<0.000000e+00> : vector<4xf32>
      %70 = vector.multi_reduction <add>, %69, %cst_40 [0] : vector<16x4xf32> to vector<4xf32>
      %71 = vector.shape_cast %70 : vector<4xf32> to vector<1x4xf32>
      %72 = tpu.iota {dimensions = array<i32: 0>} : vector<8x4xi32>
      %c0_i32_41 = arith.constant 0 : i32
      %73 = vector.broadcast %c0_i32_41 : i32 to vector<8x4xi32>
      %74 = arith.cmpi eq, %72, %73 : vector<8x4xi32>
      %cst_42 = arith.constant 0.000000e+00 : f32
      %75 = vector.shape_cast %71 : vector<1x4xf32> to vector<1x4xf32>
      %76 = vector.broadcast %75 : vector<1x4xf32> to vector<8x4xf32>
      %77 = vector.broadcast %cst_42 : f32 to vector<8x4xf32>
      %78 = arith.select %74, %76, %77 : vector<8x4xi1>, vector<8x4xf32>
      %c0_43 = arith.constant 0 : index
      %c0_44 = arith.constant 0 : index
      %79 = vector.load %arg12[%c0_43, %c0_44] : memref<8x4xf32, #tpu.memory_space<vmem>>, vector<8x4xf32>
      tpu.vector_store %arg12[%c0_43, %c0_44], %78 {strides = array<i32>} : memref<8x4xf32, #tpu.memory_space<vmem>>, vector<8x4xf32>,
    } else {
    }
    %c0_2 = arith.constant 0 : index
    %c0_3 = arith.constant 0 : index
    %c0_4 = arith.constant 0 : index
    %5 = vector.load %arg7[%c0_2, %c0_3, %c0_4] : memref<1x128x512xbf16, #tpu.memory_space<vmem>>, vector<1x128x512xbf16>
    %6 = vector.shape_cast %5 : vector<1x128x512xbf16> to vector<128x512xbf16>
    %cst = arith.constant dense<0.000000e+00> : vector<16x512xf32>
    %7 = tpu.matmul %1, %6, %cst {dimension_numbers = #tpu.dot_dimension_numbers<[1], [0], [0], [1], [0, 0, 1, 1], [], []>} : vector<16x128xbf16>, vector<128x512xbf16>, vector<16x512xf32> -> vector<16x512xf32>
    %c0_5 = arith.constant 0 : index
    %c0_6 = arith.constant 0 : index
    %c0_7 = arith.constant 0 : index
    %8 = vector.load %arg8[%c0_5, %c0_6, %c0_7] : memref<1x1x512xf32, #tpu.memory_space<vmem>>, vector<1x1x512xf32>
    %9 = vector.shape_cast %8 : vector<1x1x512xf32> to vector<1x512xf32>
    %10 = vector.broadcast %9 : vector<1x512xf32> to vector<16x512xf32>
    %11 = arith.addf %7, %10 : vector<16x512xf32>
    %cst_8 = arith.constant 0.000000e+00 : f32
    %12 = vector.broadcast %cst_8 : f32 to vector<16x512xf32>
    %13 = arith.maximumf %11, %12 : vector<16x512xf32>
    %14 = arith.truncf %13 : vector<16x512xf32> to vector<16x512xbf16>
    %c0_9 = arith.constant 0 : index
    %c0_10 = arith.constant 0 : index
    %c0_11 = arith.constant 0 : index
    %15 = vector.load %arg9[%c0_9, %c0_10, %c0_11] : memref<1x512x128xbf16, #tpu.memory_space<vmem>>, vector<1x512x128xbf16>
    %16 = vector.shape_cast %15 : vector<1x512x128xbf16> to vector<512x128xbf16>
    %cst_12 = arith.constant dense<0.000000e+00> : vector<16x128xf32>
    %17 = tpu.matmul %14, %16, %cst_12 {dimension_numbers = #tpu.dot_dimension_numbers<[1], [0], [0], [1], [0, 0, 1, 1], [], []>} : vector<16x512xbf16>, vector<512x128xbf16>, vector<16x128xf32> -> vector<16x128xf32>
    %c0_13 = arith.constant 0 : index
    %c0_14 = arith.constant 0 : index
    %c0_15 = arith.constant 0 : index
    %18 = vector.load %arg10[%c0_13, %c0_14, %c0_15] : memref<1x1x128xf32, #tpu.memory_space<vmem>>, vector<1x1x128xf32>
    %19 = vector.shape_cast %18 : vector<1x1x128xf32> to vector<1x128xf32>
    %20 = vector.broadcast %19 : vector<1x128xf32> to vector<16x128xf32>
    %21 = arith.addf %17, %20 : vector<16x128xf32>
    %22 = tpu.iota {dimensions = array<i32: 1>} : vector<1x4xi32>
    %23 = vector.broadcast %arg1 : i32 to vector<1x4xi32>
    %24 = arith.cmpi eq, %22, %23 : vector<1x4xi32>
    %25 = arith.extui %24 : vector<1x4xi1> to vector<1x4xi32>
    %26 = arith.sitofp %25 : vector<1x4xi32> to vector<1x4xf32>
    %c0_16 = arith.constant 0 : index
    %c0_17 = arith.constant 0 : index
    %27 = vector.load %arg13[%c0_16, %c0_17] : memref<16x4xf32, #tpu.memory_space<vmem>>, vector<16x4xf32>
    %28 = vector.broadcast %26 : vector<1x4xf32> to vector<16x4xf32>
    %29 = arith.mulf %27, %28 : vector<16x4xf32>
    %cst_18 = arith.constant dense<0.000000e+00> : vector<16xf32>
    %30 = vector.multi_reduction <add>, %29, %cst_18 [1] : vector<16x4xf32> to vector<16xf32>
    %31 = vector.shape_cast %30 : vector<16xf32> to vector<16x1xf32>
    %c0_i32_19 = arith.constant 0 : i32
    %32 = arith.cmpi eq, %arg1, %c0_i32_19 : i32
    %33 = arith.extui %32 : i1 to i32
    %c0_i32_20 = arith.constant 0 : i32
    %34 = arith.cmpi ne, %33, %c0_i32_20 : i32
    scf.if %34 {
      %38 = vector.broadcast %31 : vector<16x1xf32> to vector<16x128xf32>
      %39 = arith.mulf %38, %21 : vector<16x128xf32>
      %c0_23 = arith.constant 0 : index
      %c0_24 = arith.constant 0 : index
      %40 = vector.load %arg11[%c0_23, %c0_24] : memref<16x128xf32, #tpu.memory_space<vmem>>, vector<16x128xf32>
      tpu.vector_store %arg11[%c0_23, %c0_24], %39 {strides = array<i32>} : memref<16x128xf32, #tpu.memory_space<vmem>>, vector<16x128xf32>,
    } else {
    }
    %c0_i32_21 = arith.constant 0 : i32
    %35 = arith.cmpi ne, %arg1, %c0_i32_21 : i32
    %36 = arith.extui %35 : i1 to i32
    %c0_i32_22 = arith.constant 0 : i32
    %37 = arith.cmpi ne, %36, %c0_i32_22 : i32
    scf.if %37 {
      %c0_23 = arith.constant 0 : index
      %c0_24 = arith.constant 0 : index
      %38 = vector.load %arg11[%c0_23, %c0_24] : memref<16x128xf32, #tpu.memory_space<vmem>>, vector<16x128xf32>
      %39 = vector.broadcast %31 : vector<16x1xf32> to vector<16x128xf32>
      %40 = arith.mulf %39, %21 : vector<16x128xf32>
      %41 = arith.addf %38, %40 : vector<16x128xf32>
      %c0_25 = arith.constant 0 : index
      %c0_26 = arith.constant 0 : index
      %42 = vector.load %arg11[%c0_25, %c0_26] : memref<16x128xf32, #tpu.memory_space<vmem>>, vector<16x128xf32>
      tpu.vector_store %arg11[%c0_25, %c0_26], %41 {strides = array<i32>} : memref<16x128xf32, #tpu.memory_space<vmem>>, vector<16x128xf32>,
    } else {
    }
    return
  }
  func.func @transform_0(%arg0: i32, %arg1: i32) -> (i32, i32) {
    %c0_i32 = arith.constant 0 : i32
    %c0_i32_0 = arith.constant 0 : i32
    return %arg0, %c0_i32 : i32, i32
  }
  func.func @transform_1(%arg0: i32, %arg1: i32) -> (i32, i32) {
    %c0_i32 = arith.constant 0 : i32
    %c0_i32_0 = arith.constant 0 : i32
    %c0_i32_1 = arith.constant 0 : i32
    return %c0_i32, %c0_i32_0 : i32, i32
  }
  func.func @transform_2(%arg0: i32, %arg1: i32) -> (i32, i32) {
    %c0_i32 = arith.constant 0 : i32
    %c0_i32_0 = arith.constant 0 : i32
    %c0_i32_1 = arith.constant 0 : i32
    return %c0_i32, %c0_i32_0 : i32, i32
  }
  func.func @transform_3(%arg0: i32, %arg1: i32) -> (i32, i32) {
    %c0_i32 = arith.constant 0 : i32
    %c0_i32_0 = arith.constant 0 : i32
    %c0_i32_1 = arith.constant 0 : i32
    return %c0_i32, %c0_i32_0 : i32, i32
  }
  func.func @transform_4(%arg0: i32, %arg1: i32) -> (i32, i32) {
    %c0_i32 = arith.constant 0 : i32
    %c0_i32_0 = arith.constant 0 : i32
    %c0_i32_1 = arith.constant 0 : i32
    return %c0_i32, %c0_i32_0 : i32, i32
  }
  func.func @transform_5(%arg0: i32, %arg1: i32) -> (i32, i32, i32) {
    %c0_i32 = arith.constant 0 : i32
    %c0_i32_0 = arith.constant 0 : i32
    %c0_i32_1 = arith.constant 0 : i32
    return %arg1, %c0_i32, %c0_i32_0 : i32, i32, i32
  }
  func.func @transform_6(%arg0: i32, %arg1: i32) -> (i32, i32, i32) {
    %c0_i32 = arith.constant 0 : i32
    %c0_i32_0 = arith.constant 0 : i32
    %c0_i32_1 = arith.constant 0 : i32
    return %arg1, %c0_i32, %c0_i32_0 : i32, i32, i32
  }
  func.func @transform_7(%arg0: i32, %arg1: i32) -> (i32, i32, i32) {
    %c0_i32 = arith.constant 0 : i32
    %c0_i32_0 = arith.constant 0 : i32
    %c0_i32_1 = arith.constant 0 : i32
    return %arg1, %c0_i32, %c0_i32_0 : i32, i32, i32
  }
  func.func @transform_8(%arg0: i32, %arg1: i32) -> (i32, i32, i32) {
    %c0_i32 = arith.constant 0 : i32
    %c0_i32_0 = arith.constant 0 : i32
    %c0_i32_1 = arith.constant 0 : i32
    return %arg1, %c0_i32, %c0_i32_0 : i32, i32, i32
  }
  func.func @transform_9(%arg0: i32, %arg1: i32) -> (i32, i32) {
    %c0_i32 = arith.constant 0 : i32
    %c0_i32_0 = arith.constant 0 : i32
    return %arg0, %c0_i32 : i32, i32
  }
  func.func @transform_10(%arg0: i32, %arg1: i32) -> (i32, i32) {
    %c0_i32 = arith.constant 0 : i32
    %c0_i32_0 = arith.constant 0 : i32
    return %arg0, %c0_i32 : i32, i32
  }
}

</mosaic_0001>

<bundles_post_ra>
// kernel: tpu_custom_call.1
= control target key start
LH: loop header
LB: loop body
LE: loop exit
PB: predicated region body
PF: predicated region fallthrough
CT: control target
= control target key end

     0   :  { %s3346_s0 = inlined_call_operand.hbm [shape: bf16[16,128], index: 0, kind: input, shape index: {}]   ;;  %s3347_s1 = inlined_call_operand.hbm [shape: bf16[128,256], index: 1, kind: input, shape index: {}]   ;;  %s3348_s2 = inlined_call_operand.hbm [shape: f32[1,256], index: 2, kind: input, shape index: {}]   ;;  %s3349_s3 = inlined_call_operand.hbm [shape: bf16[256,4], index: 3, kind: input, shape index: {}]   ;;  %s3350_s4 = inlined_call_operand.hbm [shape: f32[1,4], index: 4, kind: input, shape index: {}]   ;;  %s3351_s5 = inlined_call_operand.hbm [shape: bf16[4,128,512], index: 5, kind: input, shape index: {}]   ;;  %s3352_s6 = inlined_call_operand.hbm [shape: f32[4,1,512], index: 6, kind: input, shape index: {}]   ;;  %s3353_s7 = inlined_call_operand.hbm [shape: bf16[4,512,128], index: 7, kind: input, shape index: {}]   ;;  %s3354_s8 = inlined_call_operand.hbm [shape: f32[4,1,128], index: 8, kind: input, shape index: {}]   ;;  %s3355_s9 = inlined_call_operand.hbm [shape: f32[16,128], index: 9, kind: output, shape index: {0}]   ;;  %s3356_s10 = inlined_call_operand.hbm [shape: f32[8,4], index: 10, kind: output, shape index: {1}]  }
   0x1   :  { %3383 = sst [smem:[#allocation34_spill]] %s3347_s1 }
   0x2   :  { %3384 = sst [smem:[#allocation35_spill]] %s3349_s3 }
   0x3   :  { %3385 = sst [smem:[#allocation36_spill]] %s3351_s5 }
   0x4   :  { %3386 = sst [smem:[#allocation37_spill]] %s3353_s7 }
   0x5   :  { %3387 = sst [smem:[#allocation38_spill]] %s3355_s9 }
   0x6   :  { %3388 = sst [smem:[#allocation39_spill]] %s3356_s10 }
   0x7   :  { %16 = vsyncpa [#allocation4], 0 }
   0x8   :  { %17 = vsyncpa [#allocation7], 0 }
   0x9   :  { %18 = vsyncpa [#allocation10], 0 }
   0xa   :  { %19 = vsyncpa [#allocation13], 0 }
   0xb   :  { %21 = vsyncpa [#allocation13 + $0x1], 0 }
   0xc   :  { %22 = vsyncpa [#allocation16], 0 }
   0xd   :  { %24 = vsyncpa [#allocation16 + $0x1], 0 }
   0xe   :  { %25 = vsyncpa [#allocation5], 0 }
   0xf   :  { %26 = vsyncpa [#allocation20], 0  ;;  %s2825_s13 = smov 0   ;;  %s2827_s14 = smov 0  }
  0x10   :  { %s2829_s15 = smov 0   ;;  %s2831_s16 = smov 0  }
  0x11   :  { %s2833_s17 = smov 0   ;;  %s2835_s18 = smov 0  }
  0x12 LB: > { %3389 = sst [smem:[#allocation28_spill]] %s2734_s15  ;;  %s2748_s19 = smov [#allocation6]   ;;  %s2746_s18 = sphi %s2835_s18, %s32_s18   ;;  %s2742_s17 = sphi %s2833_s17, %s3438_s17   ;;  %s2738_s16 = sphi %s2831_s16, %s3437_s16   ;;  %s2734_s15 = sphi %s2829_s15, %s3433_s15   ;;  %s2730_s14 = sphi %s2827_s14, %s3436_s14   ;;  %s2726_s13 = sphi %s2825_s13, %s3435_s13  }
  0x13   : > { %3390 = sst [smem:[#allocation29_spill]] %s2738_s16  ;;  %s343_s20 = sshll.u32 %s2748_s19, 4  ;;  %s2861_s20 = int_to_ptr.vmem [resolvable:$true] %s343_s20 }
  0x14   : > { %3391 = sst [smem:[#allocation30_spill]] %s2746_s18  ;;  %s2856_s21 = sadd.s32 4294967295, %s2746_s18  }
  0x15   : > { %p1881_p0 = scmp.ge.s32.totalorder %s2746_s18, 1  ;;  %p3367_p1 = scmp.eq.s32.totalorder %s2856_s21, 0 }
  0x16   : > { %p315_p2 = scmp.lt.s32.totalorder %s2746_s18, 5  ;;  %s2749_s24 = smov [#allocation9]  }
  0x17   : > { %s367_s25 = sshll.u32 %s2749_s24, 4  ;;  %s3394_s1 = sld [smem:[#allocation34_spill]]  ;;  %s2875_s25 = int_to_ptr.vmem [resolvable:$true] %s367_s25 }
  0x18   : > { %p2863_p3 = pnand %p1881_p0, %p315_p2 }
  0x1a   : > { %s3392_s22 = scalar_select %p2863_p3, 1, 0 }
  0x1b   : > { %p2122_p4 = pneg %p2863_p3 }
  0x1d   : > { %p2871_p5 = pnand %p2122_p4, %p3367_p1  ;;  %s2360_s28 = scalar_lea.hbm %s3394_s1, 2048 }
  0x1e   : > { %p2361_p6 = scmp.ne.s32.totalorder %s3394_s1, %s2360_s28  ;;  %p2367_p10 = scmp.lt.u32.totalorder %s2360_s28, %s3394_s1 }
  0x1f   : > { %s3393_s23 = scalar_select %p2871_p5, 1, 0 }
  0x20   : > { %p2885_p7 = pneg %p2871_p5 }
  0x22   : > { %s3395_s11 = scalar_select %p2885_p7, 1, 0 }
  0x23   : > { %p2363_p8 = pnand %p2885_p7, %p2361_p6 }
  0x25   : > { %p2364_p9 = pneg %p2363_p8 }
  0x27   : > { %p2369_p11 = pnand %p2367_p10, %p2364_p9 }
  0x29   : > { %2372 = shalt.err (!%p2369_p11)
}
  0x2a   : > { %s2373_s24 = scalar_lea.vmem %s2861_s20, 2048  ;;  %p2381_p2 = scmp.lt.s32.totalorder %s2861_s20, %s2861_s20 }
  0x2b   : > { %p2374_p12 = scmp.ne.s32.totalorder %s2861_s20, %s2373_s24  ;;  %p2382_p4 = scmp.lt.s32.totalorder %s2373_s24, %s2373_s24 }
  0x2d   : > { %p2376_p13 = pnand %p2374_p12, %p2885_p7  ;;  %p2383_p6 = por %p2382_p4, %p2381_p2 }
  0x2f   : > { %p2377_p0 = pneg %p2376_p13 }
  0x31   : > { %p2384_p8 = pnand %p2383_p6, %p2377_p0 }
  0x33   : > { %2387 = shalt.err (!%p2384_p8)
}
  0x34   : > { %s2750_s26 = smov 128   ;;  %s2751_s27 = smov 8  }
  0x35   : > { %2128 = dma.hbm_to_vmem [thread:$0]  (!%p2871_p5), %s3394_s1, 2048, %s2861_s20, [#allocation7], %s2750_s26, %s2750_s26, %s2751_s27  }
  0x36   : > { %s3396_s3 = sld [smem:[#allocation35_spill]] }
  0x3c   : > { %s2388_s19 = scalar_lea.hbm %s3396_s3, 2048 }
  0x3d   : > { %p2389_p9 = scmp.ne.s32.totalorder %s3396_s3, %s2388_s19  ;;  %p2395_p12 = scmp.lt.u32.totalorder %s2388_s19, %s3396_s3 }
  0x3f   : > { %p2391_p10 = pnand %p2389_p9, %p2885_p7 }
  0x41   : > { %p2392_p11 = pneg %p2391_p10 }
  0x43   : > { %p2397_p13 = pnand %p2395_p12, %p2392_p11 }
  0x45   : > { %2400 = shalt.err (!%p2397_p13)
}
  0x46   : > { %s2401_s20 = scalar_lea.vmem %s2875_s25, 2048  ;;  %p2409_p6 = scmp.lt.s32.totalorder %s2875_s25, %s2875_s25 }
  0x47   : > { %p2402_p0 = scmp.ne.s32.totalorder %s2875_s25, %s2401_s20  ;;  %p2410_p8 = scmp.lt.s32.totalorder %s2401_s20, %s2401_s20 }
  0x49   : > { %p2404_p2 = pnand %p2402_p0, %p2885_p7  ;;  %p2411_p9 = por %p2410_p8, %p2409_p6 }
  0x4b   : > { %p2405_p4 = pneg %p2404_p2 }
  0x4d   : > { %p2412_p10 = pnand %p2411_p9, %p2405_p4 }
  0x4f   : > { %2415 = shalt.err (!%p2412_p10)
}
  0x50   : > { %s3361_s9 = smov 64   ;;  %s3363_s10 = smov 4  }
  0x51   : > { %2134 = dma.hbm_to_vmem [thread:$0]  (!%p2871_p5), %s3396_s3, 2048, %s2875_s25, [#allocation10], %s3361_s9, %s3361_s9, %s3363_s10  }
  0x52   : > { %s41_s27 = sadd.s32 1, %s2742_s17  ;;  %s161_s28 = sadd.s32 1, %s2734_s15 }
  0x53   : > { %p42_p11 = scmp.ge.s32.totalorder %s41_s27, 4  ;;  %p168_p12 = scmp.ne.s32.totalorder %s2734_s15, %s2730_s14 }
  0x54   : > { %p169_p13 = scmp.eq.s32.totalorder %s2746_s18, 0  ;;  %p174_p0 = scmp.ne.s32.totalorder %s2730_s14, %s2726_s13 }
  0x55   : > { %s3440_s27 = smov (%p42_p11, %s41_s27), 0  ;;  %p2156_p6 = scmp.lt.s32.totalorder %s2746_s18, 4 }
  0x56   : > { %3397 = sst [smem:[#allocation31_spill]] %s3440_s27  ;;  %p2941_p2 = por %p169_p13, %p168_p12 }
  0x57   : > { %p2947_p4 = por %p3367_p1, %p174_p0  ;;  %s158_s30 = ssub.s32 %s2742_s17, %s3440_s27 }
  0x58   : > { %p159_p8 = scmp.eq.s32.totalorder %s158_s30, 0  ;;  %s2956_s19 = sand.u32 1, %s2734_s15  }
  0x59   : > { %s3399_s25 = scalar_select %p2947_p4, 1, 0 }
  0x5a   : > { %s2959_s13 = scalar_select %p159_p8, %s2734_s15, %s161_s28  }
  0x5b   : > { %3400 = sst [smem:[#allocation32_spill]] %s3399_s25  ;;  %s3365_s24 = sshll.u32 %s2956_s19, 8 }
  0x5c   : > { %3401 = sst [smem:[#allocation33_spill]] %s2959_s13  ;;  %s3366_s20 = sshll.u32 %s2742_s17, 12 }
  0x5d   : > { %s3402_s5 = sld [smem:[#allocation36_spill]]  ;;  %s396_s30 = scalar_lea.vmem [#allocation12], %s3365_s24 }
  0x5e   : > { %s403_s10 = sshll.u32 %s396_s30, 4  ;;  %p2974_p9 = pnand %p2156_p6, %p2941_p2  ;;  %s2978_s10 = int_to_ptr.vmem [resolvable:$true] %s403_s10 }
  0x5f   : > { %s3404_s28 = sand.u32 1, %s2746_s18  }
  0x60   : > { %s3403_s12 = scalar_select %p2974_p9, 1, 0 }
  0x61   : > { %s2982_s1 = scalar_lea.sflag [#allocation13], %s3404_s28  ;;  %p2988_p11 = pneg %p2974_p9 }
  0x63   : > { %s2968_s9 = scalar_lea.hbm %s3402_s5, %s3366_s20  ;;  %s2421_s24 = scalar_lea.hbm %s3402_s5, 16384 }
  0x64   : > { %s2416_s16 = scalar_lea.hbm %s2968_s9, 4096  ;;  %p2422_p0 = scmp.lt.u32.totalorder %s2968_s9, %s3402_s5 }
  0x65   : > { %p2417_p10 = scmp.ne.s32.totalorder %s2968_s9, %s2416_s16  ;;  %p2423_p2 = scmp.lt.u32.totalorder %s2421_s24, %s2416_s16 }
  0x66   : > { %s3405_s26 = scalar_select %p2988_p11, 1, 0 }
  0x67   : > { %p2419_p12 = pnand %p2988_p11, %p2417_p10  ;;  %p2424_p6 = por %p2423_p2, %p2422_p0 }
  0x68   : > { %p2425_p8 = scmp.lt.u32.totalorder %s2416_s16, %s2968_s9 }
  0x69   : > { %p2420_p13 = pneg %p2419_p12 }
  0x6a   : > { %p2426_p1 = por %p2425_p8, %p2424_p6 }
  0x6c   : > { %p2427_p4 = pnand %p2426_p1, %p2420_p13 }
  0x6e   : > { %2430 = shalt.err (!%p2427_p4)
}
  0x6f   : > { %s2431_s28 = scalar_lea.vmem %s2978_s10, 4096  ;;  %s2754_s29 = smov [#allocation12]  }
  0x70   : > { %p2432_p10 = scmp.ne.s32.totalorder %s2978_s10, %s2431_s28  ;;  %s2436_s30 = sshll.u32 %s2754_s29, 4  ;;  %s2437_s30 = int_to_ptr.vmem [resolvable:$false] %s2436_s30 }
  0x71   : > { %s2438_s3 = scalar_lea.vmem %s2437_s30, 8192  ;;  %p2439_p5 = scmp.lt.s32.totalorder %s2978_s10, %s2437_s30 }
  0x72   : > { %p2434_p12 = pnand %p2432_p10, %p2988_p11  ;;  %p2440_p7 = scmp.lt.s32.totalorder %s2438_s3, %s2431_s28 }
  0x74   : > { %p2435_p3 = pneg %p2434_p12  ;;  %p2441_p0 = por %p2440_p7, %p2439_p5 }
  0x76   : > { %p2442_p2 = pnand %p2441_p0, %p2435_p3 }
  0x78   : > { %2445 = shalt.err (!%p2442_p2)
}
  0x79   : > { %s2755_s24 = smov 256   ;;  %s2756_s20 = smov 16  }
  0x7a   : > { %2141 = dma.hbm_to_vmem [thread:$0]  (!%p2974_p9), %s2968_s9, 4096, %s2978_s10, %s2982_s1, %s2755_s24, %s2755_s24, %s2756_s20  }
  0x7b   : > { %s3406_s16 = sshll.u32 %s2742_s17, 12  ;;  %s3407_s7 = sld [smem:[#allocation37_spill]] }
  0x7c   : > { %s3408_s30 = sshll.u32 %s2956_s19, 8  ;;  %s3409_s13 = sand.u32 1, %s2746_s18  }
  0x7d   : > { %s436_s3 = scalar_lea.vmem [#allocation15], %s3408_s30  ;;  %s3025_s15 = scalar_lea.sflag [#allocation16], %s3409_s13 }
  0x7e   : > { %s443_s27 = sshll.u32 %s436_s3, 4  ;;  %s3021_s27 = int_to_ptr.vmem [resolvable:$true] %s443_s27 }
  0x81   : > { %s3017_s28 = scalar_lea.hbm %s3407_s7, %s3406_s16  ;;  %s2451_s10 = scalar_lea.hbm %s3407_s7, 16384 }
  0x82   : > { %s2446_s25 = scalar_lea.hbm %s3017_s28, 4096  ;;  %p2452_p7 = scmp.lt.u32.totalorder %s3017_s28, %s3407_s7 }
  0x83   : > { %p2447_p1 = scmp.ne.s32.totalorder %s3017_s28, %s2446_s25  ;;  %p2453_p4 = scmp.lt.u32.totalorder %s2451_s10, %s2446_s25 }
  0x84   : > { %p2455_p6 = scmp.lt.u32.totalorder %s2446_s25, %s3017_s28 }
  0x85   : > { %p2449_p3 = pnand %p2447_p1, %p2988_p11  ;;  %p2454_p13 = por %p2453_p4, %p2452_p7 }
  0x87   : > { %p2450_p5 = pneg %p2449_p3  ;;  %p2456_p8 = por %p2455_p6, %p2454_p13 }
  0x89   : > { %p2457_p10 = pnand %p2456_p8, %p2450_p5 }
  0x8b   : > { %2460 = shalt.err (!%p2457_p10)
}
  0x8c   : > { %s2461_s13 = scalar_lea.vmem %s3021_s27, 4096  ;;  %s2757_s16 = smov [#allocation15]  }
  0x8d   : > { %p2462_p12 = scmp.ne.s32.totalorder %s3021_s27, %s2461_s13  ;;  %s2466_s29 = sshll.u32 %s2757_s16, 4  ;;  %s2467_s29 = int_to_ptr.vmem [resolvable:$false] %s2466_s29 }
  0x8e   : > { %s2468_s30 = scalar_lea.vmem %s2467_s29, 8192  ;;  %p2469_p1 = scmp.lt.s32.totalorder %s3021_s27, %s2467_s29 }
  0x8f   : > { %p2464_p0 = pnand %p2462_p12, %p2988_p11  ;;  %p2470_p3 = scmp.lt.s32.totalorder %s2468_s30, %s2461_s13 }
  0x91   : > { %p2465_p2 = pneg %p2464_p0  ;;  %p2471_p7 = por %p2470_p3, %p2469_p1 }
  0x93   : > { %p2472_p4 = pnand %p2471_p7, %p2465_p2 }
  0x95   : > { %2475 = shalt.err (!%p2472_p4)
}
  0x96   : > { %s3410_s25 = smov 4   ;;  %s3411_s3 = smov 64  }
  0x97   : > { %2147 = dma.hbm_to_vmem [thread:$0]  (!%p2974_p9), %s3017_s28, 4096, %s3021_s27, %s3025_s15, %s3411_s3, %s3411_s3, %s3410_s25  }
  0x98   : > { %s2758_s5 = smov [#allocation3]   ;;  %s2759_s10 = smov [#allocation8]  }
  0x99   : > { %s330_s9 = sshll.u32 %s2758_s5, 4  ;;  %s357_s24 = sshll.u32 %s2759_s10, 4  ;;  %s331_s9 = int_to_ptr.vmem [resolvable:$true] %s330_s9  ;;  %s358_s24 = int_to_ptr.vmem [resolvable:$true] %s357_s24 }
  0x9a   : > { %s2476_s16 = scalar_lea.hbm %s3346_s0, 128  ;;  %p3412_p13 = scmp.ne.s32.totalorder %s3395_s11, 0 }
  0x9b   : > { %p2477_p5 = scmp.ne.s32.totalorder %s3346_s0, %s2476_s16  ;;  %p2483_p10 = scmp.lt.u32.totalorder %s2476_s16, %s3346_s0 }
  0x9d   : > { %p2479_p6 = pnand %p2477_p5, %p3412_p13 }
  0x9f   : > { %p2480_p8 = pneg %p2479_p6 }
  0xa1   : > { %p2485_p12 = pnand %p2483_p10, %p2480_p8 }
  0xa3   : > { %2488 = shalt.err (!%p2485_p12)
}
  0xa4   : > { %s2489_s27 = scalar_lea.vmem %s331_s9, 128  ;;  %p2497_p3 = scmp.lt.s32.totalorder %s331_s9, %s331_s9 }
  0xa5   : > { %p2490_p0 = scmp.ne.s32.totalorder %s331_s9, %s2489_s27  ;;  %p2498_p7 = scmp.lt.s32.totalorder %s2489_s27, %s2489_s27 }
  0xa7   : > { %p2492_p2 = pnand %p2490_p0, %p3412_p13  ;;  %p2499_p4 = por %p2498_p7, %p2497_p3 }
  0xa9   : > { %p2493_p1 = pneg %p2492_p2 }
  0xab   : > { %p2500_p9 = pnand %p2499_p4, %p2493_p1 }
  0xad   : > { %2503 = shalt.err (!%p2500_p9)
}
  0xae   : > { %p3413_p5 = scmp.ne.s32.totalorder %s3393_s23, 0  ;;  %s2504_s10 = scalar_lea.hbm %s3348_s2, 32 }
  0xaf   : > { %p2505_p6 = scmp.ne.s32.totalorder %s3348_s2, %s2504_s10  ;;  %p2511_p10 = scmp.lt.u32.totalorder %s2504_s10, %s3348_s2 }
  0xb0   : > { %2125 = dma.hbm_to_vmem [thread:$0]  (!%p3413_p5), %s3346_s0, 128, %s331_s9, [#allocation4], %s3411_s3, %s3411_s3, %s3410_s25  }
  0xb1   : > { %p2507_p9 = pnand %p2505_p6, %p3412_p13 }
  0xb3   : > { %p2508_p8 = pneg %p2507_p9 }
  0xb5   : > { %p2513_p12 = pnand %p2511_p10, %p2508_p8 }
  0xb7   : > { %2516 = shalt.err (!%p2513_p12)
}
  0xb8   : > { %s2517_s30 = scalar_lea.vmem %s358_s24, 32  ;;  %p2525_p3 = scmp.lt.s32.totalorder %s358_s24, %s358_s24 }
  0xb9   : > { %p2518_p0 = scmp.ne.s32.totalorder %s358_s24, %s2517_s30  ;;  %p2526_p7 = scmp.lt.s32.totalorder %s2517_s30, %s2517_s30 }
  0xbb   : > { %p2520_p2 = pnand %p2518_p0, %p3412_p13  ;;  %p2527_p4 = por %p2526_p7, %p2525_p3 }
  0xbd   : > { %p2521_p1 = pneg %p2520_p2 }
  0xbf   : > { %p2528_p11 = pnand %p2527_p4, %p2521_p1 }
  0xc1   : > { %2531 = shalt.err (!%p2528_p11)
}
  0xc2   : > { %2131 = dma.hbm_to_vmem [thread:$0]  (!%p3413_p5), %s3348_s2, 32, %s358_s24, [#allocation7]  }
  0xc3   : > { %s2760_s9 = smov [#allocation11]   ;;  %s1891_s7 = sshll.u32 %s2956_s19, 2 }
  0xc4   : > { %s381_s27 = sshll.u32 %s2760_s9, 4  ;;  %s2532_s5 = scalar_lea.hbm %s3350_s4, 16  ;;  %s382_s27 = int_to_ptr.vmem [resolvable:$true] %s381_s27 }
  0xc5   : > { %p2533_p11 = scmp.ne.s32.totalorder %s3350_s4, %s2532_s5  ;;  %p2539_p8 = scmp.lt.u32.totalorder %s2532_s5, %s3350_s4 }
  0xc7   : > { %p2535_p6 = pnand %p2533_p11, %p3412_p13 }
  0xc9   : > { %p2536_p9 = pneg %p2535_p6 }
  0xcb   : > { %p2541_p10 = pnand %p2539_p8, %p2536_p9 }
  0xcd   : > { %2544 = shalt.err (!%p2541_p10)
}
  0xce   : > { %s2545_s24 = scalar_lea.vmem %s382_s27, 16  ;;  %s2552_s29 = scalar_lea.vmem %s382_s27, 32 }
  0xcf   : > { %p2546_p12 = scmp.ne.s32.totalorder %s382_s27, %s2545_s24  ;;  %p2553_p1 = scmp.lt.s32.totalorder %s382_s27, %s382_s27 }
  0xd0   : > { %p2554_p3 = scmp.lt.s32.totalorder %s2552_s29, %s2545_s24 }
  0xd1   : > { %p2548_p0 = pnand %p2546_p12, %p3412_p13 }
  0xd2   : > { %p2555_p7 = por %p2554_p3, %p2553_p1 }
  0xd3   : > { %p2549_p2 = pneg %p2548_p0 }
  0xd5   : > { %p2556_p4 = pnand %p2555_p7, %p2549_p2 }
  0xd7   : > { %2559 = shalt.err (!%p2556_p4)
}
  0xd8   : > { %2137 = dma.hbm_to_vmem [thread:$0]  (!%p3413_p5), %s3350_s4, 16, %s382_s27, [#allocation10]  }
  0xd9   : > { %s2018_s3 = sshll.u32 %s2742_s17, 6  ;;  %s417_s9 = scalar_lea.vmem [#allocation14], %s1891_s7 }
  0xda   : > { %s425_s18 = sshll.u32 %s417_s9, 4  ;;  %s423_s5 = scalar_lea.hbm %s3352_s6, %s2018_s3  ;;  %s426_s18 = int_to_ptr.vmem [resolvable:$true] %s425_s18 }
  0xdb   : > { %s2560_s10 = scalar_lea.hbm %s423_s5, 64  ;;  %p3414_p11 = scmp.ne.s32.totalorder %s3405_s26, 0 }
  0xdc   : > { %p2561_p13 = scmp.ne.s32.totalorder %s423_s5, %s2560_s10  ;;  %s2565_s13 = scalar_lea.hbm %s3352_s6, 256 }
  0xdd   : > { %p2566_p5 = scmp.lt.u32.totalorder %s423_s5, %s3352_s6  ;;  %p2567_p8 = scmp.lt.u32.totalorder %s2565_s13, %s2560_s10 }
  0xde   : > { %p2563_p6 = pnand %p2561_p13, %p3414_p11  ;;  %p2569_p12 = scmp.lt.u32.totalorder %s2560_s10, %s423_s5 }
  0xdf   : > { %p2568_p10 = por %p2567_p8, %p2566_p5 }
  0xe0   : > { %p2564_p9 = pneg %p2563_p6 }
  0xe1   : > { %p2570_p0 = por %p2569_p12, %p2568_p10 }
  0xe3   : > { %p2571_p2 = pnand %p2570_p0, %p2564_p9 }
  0xe5   : > { %2574 = shalt.err (!%p2571_p2)
}
  0xe6   : > { %s2575_s27 = scalar_lea.vmem %s426_s18, 64  ;;  %s2761_s7 = smov [#allocation14]  }
  0xe7   : > { %p2576_p1 = scmp.ne.s32.totalorder %s426_s18, %s2575_s27  ;;  %s2580_s29 = sshll.u32 %s2761_s7, 4  ;;  %s2581_s29 = int_to_ptr.vmem [resolvable:$false] %s2580_s29 }
  0xe8   : > { %s2582_s30 = scalar_lea.vmem %s2581_s29, 128  ;;  %p2583_p4 = scmp.lt.s32.totalorder %s426_s18, %s2581_s29 }
  0xe9   : > { %p2578_p3 = pnand %p2576_p1, %p3414_p11  ;;  %p2584_p13 = scmp.lt.s32.totalorder %s2582_s30, %s2575_s27 }
  0xeb   : > { %p2579_p7 = pneg %p2578_p3  ;;  %p2585_p6 = por %p2584_p13, %p2583_p4 }
  0xed   : > { %p2586_p5 = pnand %p2585_p6, %p2579_p7 }
  0xef   : > { %2589 = shalt.err (!%p2586_p5)
}
  0xf0   : > { %p3415_p8 = scmp.ne.s32.totalorder %s3403_s12, 0  ;;  %s1897_s25 = sshll.u32 %s2742_s17, 4 }
  0xf1   : > { %s3131_s11 = scalar_lea.hbm %s3354_s8, %s1897_s25  ;;  %s456_s28 = scalar_lea.vmem [#allocation17], %s2956_s19 }
  0xf2   : > { %2144 = dma.hbm_to_vmem [thread:$0]  (!%p3415_p8), %s423_s5, 64, %s426_s18, %s2982_s1  }
  0xf3   : > { %s463_s10 = sshll.u32 %s456_s28, 4  ;;  %s2590_s23 = scalar_lea.hbm %s3131_s11, 16  ;;  %s464_s10 = int_to_ptr.vmem [resolvable:$true] %s463_s10 }
  0xf4   : > { %p2591_p9 = scmp.ne.s32.totalorder %s3131_s11, %s2590_s23  ;;  %s2595_s18 = scalar_lea.hbm %s3354_s8, 64 }
  0xf5   : > { %p2596_p0 = scmp.lt.u32.totalorder %s3131_s11, %s3354_s8  ;;  %p2597_p2 = scmp.lt.u32.totalorder %s2595_s18, %s2590_s23 }
  0xf6   : > { %p2593_p10 = pnand %p2591_p9, %p3414_p11  ;;  %p2599_p3 = scmp.lt.u32.totalorder %s2590_s23, %s3131_s11 }
  0xf7   : > { %p2598_p1 = por %p2597_p2, %p2596_p0 }
  0xf8   : > { %p2594_p12 = pneg %p2593_p10 }
  0xf9   : > { %p2600_p7 = por %p2599_p3, %p2598_p1 }
  0xfb   : > { %p2601_p4 = pnand %p2600_p7, %p2594_p12 }
  0xfd   : > { %2604 = shalt.err (!%p2601_p4)
}
  0xfe   : > { %s2605_s19 = scalar_lea.vmem %s464_s10, 16  ;;  %s2762_s16 = smov [#allocation17]  }
  0xff   : > { %p2606_p13 = scmp.ne.s32.totalorder %s464_s10, %s2605_s19  ;;  %s2610_s24 = sshll.u32 %s2762_s16, 4  ;;  %s2611_s24 = int_to_ptr.vmem [resolvable:$false] %s2610_s24 }
 0x100   : > { %s2612_s27 = scalar_lea.vmem %s2611_s24, 32  ;;  %p2613_p9 = scmp.lt.s32.totalorder %s464_s10, %s2611_s24 }
 0x101   : > { %p2608_p6 = pnand %p2606_p13, %p3414_p11  ;;  %p2614_p10 = scmp.lt.s32.totalorder %s2612_s27, %s2605_s19 }
 0x103   : > { %p2609_p5 = pneg %p2608_p6  ;;  %p2615_p8 = por %p2614_p10, %p2613_p9 }
 0x105   : > { %p2616_p0 = pnand %p2615_p8, %p2609_p5 }
 0x107   : > { %2619 = shalt.err (!%p2616_p0)
}
 0x108   : > { %p3416_p2 = scmp.ne.s32.totalorder %s3403_s12, 0  ;;  %p3417_p12 = scmp.ne.s32.totalorder %s3392_s22, 0 }
 0x109   : > { %p3418_p11 = scmp.eq.s32.totalorder (!%p3417_p12), %s2856_s21, 0 }
 0x10a   : > { %2150 = dma.hbm_to_vmem [thread:$0]  (!%p3416_p2), %s3131_s11, 16, %s464_s10, %s3025_s15  }
 0x10b   : > { %472 = sbr.rel (%p3417_p12) target bundleno = 1667 (0x683), region = 56 }
 0x112   : > { %2697 = dma.done.wait (%p3418_p11), [#allocation4], 128   ;;  %p3419_p1 = pmov %p3418_p11 }
 0x114   : > { %2699 = vsyncadd (%p3419_p1), [#allocation4], 4294967168  ;;  %p3420_p3 = pmov %p3419_p1 }
 0x115   : > { %p3421_p8 = pmov %p3419_p1 }
 0x116   : > { %2701 = dma.done.wait (%p3420_p3), [#allocation7], 2080  }
 0x117   : > { %2703 = vsyncadd (%p3421_p8), [#allocation7], 4294965216  ;;  %p3422_p7 = pmov %p3419_p1 }
 0x118   : > { %p3423_p4 = pmov %p3419_p1 }
 0x119   : > { %2705 = dma.done.wait (%p3422_p7), [#allocation10], 2064  }
 0x11a   : > { %2707 = vsyncadd (%p3423_p4), [#allocation10], 4294965232  ;;  %s3424_s15 = sld [smem:[#allocation32_spill]]  ;;  %s494_s22 = sand.u32 1, %s2856_s21  }
 0x11b   : > { %s3168_s12 = sand.u32 1, %s2730_s14   ;;  %s495_s7 = scalar_lea.sflag [#allocation13], %s494_s22 }
 0x11c   : > { %s1904_s26 = sshll.u32 %s3168_s12, 8 }
 0x11d   : > { %s3171_s29 = scalar_lea.vmem [#allocation12], %s1904_s26 }
 0x120   : > { %p3425_p13 = scmp.ne.s32.totalorder %s3424_s15, 0 }
 0x122   : > { %2709 = dma.done.wait (%p3425_p13), %s495_s7, 4160  }
 0x123   : > { %2711 = vsyncadd (%p3425_p13), %s495_s7, 4294963136  ;;  %s1905_s30 = sshll.u32 %s3168_s12, 2  ;;  %s513_s3 = scalar_lea.sflag [#allocation16], %s494_s22 }
 0x124   : > { %s3178_s25 = scalar_lea.vmem [#allocation14], %s1905_s30  ;;  %s3180_s9 = scalar_lea.vmem [#allocation15], %s1904_s26 }
 0x125   : > { %2713 = dma.done.wait (%p3425_p13), %s513_s3, 4112  }
 0x126   : > { %2715 = vsyncadd (%p3425_p13), %s513_s3, 4294963184  ;;  %v3186_v0 = vld [vmem:[#allocation3] sm:$0xf]  ;;  %v3188_v1 = vld [vmem:[#allocation3 + $0x4] sm:$0xf]  ;;  %s524_s11 = scalar_lea.vmem [#allocation17], %s3168_s12 }
 0x127   : > { %s3426_s28 = sld [smem:[#allocation29_spill]] }
 0x12d   : > { %p1907_p6 = scmp.ne.s32.totalorder %s3426_s28, 0 }
 0x12e   : > { %v2232_v2 = vld [vmem:[#allocation6 + $0x4] ss:$8 sps:$4 sm:$0xff] (!%p1907_p6)   ;;  %v2234_v3 = vld [vmem:[#allocation6] ss:$8 sps:$4 sm:$0xff] (!%p1907_p6)   ;;  %v2763_v4 = vmov (!%p1907_p6), 0   ;;  %v2260_v17 = vld [vmem:[#allocation9 + $0x50] sm:$0xff] (!%p1907_p6)   ;;  %v1908_v30 = vcombine.low (!%p1907_p6), %v3186_v0, %v3188_v1  ;;  %v598_v36 = vlaneseq (!%p1907_p6) }
 0x12f   : > { %579 = sbr.rel (%p1907_p6) target bundleno = 1109 (0x455), region = 96  ;;  %726 = vmatprep.mubr.bf16.mxu0 (!%p1907_p6), %v2763_v4  ;;  %694 = vmatprep.subr.bf16.mxu0 (!%p1907_p6), %v2232_v2  ;;  %v2235_v5 = vld [vmem:[#allocation6 + $0x14] ss:$8 sps:$4 sm:$0xff] (!%p1907_p6)   ;;  %v2237_v6 = vld [vmem:[#allocation6 + $0x10] ss:$8 sps:$4 sm:$0xff] (!%p1907_p6)   ;;  %v2256_v12 = vld [vmem:[#allocation9 + $0x40] sm:$0xff] (!%p1907_p6)  }
 0x130   : > { %695 = vmatpush1.bf16.msra.mxu0 (!%p1907_p6), %v2234_v3  ;;  %v2238_v7 = vld [vmem:[#allocation6 + $0x24] ss:$8 sps:$4 sm:$0xff] (!%p1907_p6)   ;;  %v2240_v8 = vld [vmem:[#allocation6 + $0x20] ss:$8 sps:$4 sm:$0xff] (!%p1907_p6)   ;;  %v2241_v9 = vld [vmem:[#allocation6 + $0x34] ss:$8 sps:$4 sm:$0xff] (!%p1907_p6)   ;;  %2020 = vmatprep.subr.bf16.mxu1 (!%p1907_p6), %v2256_v12 }
 0x131   : > { %696 = vmatprep.subr.bf16.mxu0 (!%p1907_p6), %v2235_v5  ;;  %v2243_v10 = vld [vmem:[#allocation6 + $0x30] ss:$8 sps:$4 sm:$0xff] (!%p1907_p6)   ;;  %v2244_v11 = vld [vmem:[#allocation6 + $0x44] ss:$8 sps:$4 sm:$0xff] (!%p1907_p6)   ;;  %v2246_v14 = vld [vmem:[#allocation6 + $0x40] ss:$8 sps:$4 sm:$0xff] (!%p1907_p6)  }
 0x132   : > { %v2257_v13 = vld [vmem:[#allocation9] sm:$0xff] (!%p1907_p6)   ;;  %v2258_v15 = vld [vmem:[#allocation9 + $0x48] sm:$0xff] (!%p1907_p6)   ;;  %v2247_v18 = vld [vmem:[#allocation6 + $0x54] ss:$8 sps:$4 sm:$0xff] (!%p1907_p6)   ;;  %v3196_v37 = vshrl.u32 (!%p1907_p6), %v598_v36, 7  ;;  %vm919_vm0 = vcmask (!%p1907_p6), 31744  }
 0x133   : > { %2021 = vmatpush3.bf16.msra.mxu1 (!%p1907_p6), %v2257_v13  ;;  %v2259_v16 = vld [vmem:[#allocation9 + $0x8] sm:$0xff] (!%p1907_p6)   ;;  %v2261_v20 = vld [vmem:[#allocation9 + $0x10] sm:$0xff] (!%p1907_p6)   ;;  %v2262_v21 = vld [vmem:[#allocation9 + $0x58] sm:$0xff] (!%p1907_p6)  }
 0x134   : > { %697 = vmatpush1.bf16.msra.mxu0 (!%p1907_p6), %v2237_v6  ;;  %2022 = vmatprep.subr.bf16.mxu1 (!%p1907_p6), %v2258_v15  ;;  %v2249_v19 = vld [vmem:[#allocation6 + $0x50] ss:$8 sps:$4 sm:$0xff] (!%p1907_p6)   ;;  %v2250_v22 = vld [vmem:[#allocation6 + $0x64] ss:$8 sps:$4 sm:$0xff] (!%p1907_p6)   ;;  %v2252_v23 = vld [vmem:[#allocation6 + $0x60] ss:$8 sps:$4 sm:$0xff] (!%p1907_p6)  }
 0x135   : > { %698 = vmatprep.subr.bf16.mxu0 (!%p1907_p6), %v2238_v7  ;;  %v2263_v24 = vld [vmem:[#allocation9 + $0x18] sm:$0xff] (!%p1907_p6)   ;;  %v2264_v25 = vld [vmem:[#allocation9 + $0x60] sm:$0xff] (!%p1907_p6)   ;;  %v2266_v29 = vld [vmem:[#allocation9 + $0x68] sm:$0xff] (!%p1907_p6)   ;;  %v600_v38 = vsub.s32 (!%p1907_p6), 0, %v3196_v37  ;;  %v604_v40 = vsub.s32 (!%p1907_p6), 1, %v3196_v37  ;;  %vm967_vm1 = vcmp.eq.s32.totalorder (!%p1907_p6), %v3196_v37, 0 }
 0x136   : > { %v2253_v26 = vld [vmem:[#allocation6 + $0x74] ss:$8 sps:$4 sm:$0xff]   ;;  %v2265_v27 = vld [vmem:[#allocation9 + $0x20] sm:$0xff]   ;;  %v2255_v28 = vld [vmem:[#allocation6 + $0x70] ss:$8 sps:$4 sm:$0xff]  }
 0x137   : > { %2023 = vmatpush3.bf16.msra.mxu1 %v2259_v16  ;;  %v2267_v31 = vld [vmem:[#allocation9 + $0x28] sm:$0xff]   ;;  %v2268_v32 = vld [vmem:[#allocation9 + $0x70] sm:$0xff]   ;;  %v2270_v34 = vld [vmem:[#allocation9 + $0x78] sm:$0xff]  }
 0x138   : > { %699 = vmatpush1.bf16.msra.mxu0 %v2240_v8  ;;  %2024 = vmatprep.subr.bf16.mxu1 %v2260_v17  ;;  %v2269_v33 = vld [vmem:[#allocation9 + $0x30] sm:$0xff]   ;;  %v2271_v35 = vld [vmem:[#allocation9 + $0x38] sm:$0xff]   ;;  %v1925_v59 = vld [vmem:[#allocation11] ss:$0 sm:$0xff] }
 0x139   : > { %700 = vmatprep.subr.bf16.mxu0 %v2241_v9  ;;  %v596_v39 = vld [vmem:[#allocation8] sm:$0x3] }
 0x13a   : > { %v601_v41 = vrot.slane %v596_v39, %v600_v38  ;;  %v605_v42 = vrot.slane %v596_v39, %v604_v40 }
 0x13b   : > { %2025 = vmatpush3.bf16.msra.mxu1 %v2261_v20 }
 0x13c   : > { %701 = vmatpush1.bf16.msra.mxu0 %v2243_v10  ;;  %2026 = vmatprep.subr.bf16.mxu1 %v2262_v21 }
 0x13d   : > { %702 = vmatprep.subr.bf16.mxu0 %v2244_v11 }
 0x13f   : > { %2027 = vmatpush3.bf16.msra.mxu1 %v2263_v24 }
 0x140   : > { %703 = vmatpush1.bf16.msra.mxu0 %v2246_v14  ;;  %2028 = vmatprep.subr.bf16.mxu1 %v2264_v25 }
 0x141   : > { %704 = vmatprep.subr.bf16.mxu0 %v2247_v18 }
 0x143   : > { %2029 = vmatpush3.bf16.msra.mxu1 %v2265_v27 }
 0x144   : > { %705 = vmatpush1.bf16.msra.mxu0 %v2249_v19  ;;  %2030 = vmatprep.subr.bf16.mxu1 %v2266_v29 }
 0x145   : > { %706 = vmatprep.subr.bf16.mxu0 %v2250_v22 }
 0x147   : > { %2031 = vmatpush3.bf16.msra.mxu1 %v2267_v31 }
 0x148   : > { %707 = vmatpush1.bf16.msra.mxu0 %v2252_v23  ;;  %2032 = vmatprep.subr.bf16.mxu1 %v2268_v32 }
 0x149   : > { %708 = vmatprep.subr.bf16.mxu0 %v2253_v26 }
 0x14b   : > { %2033 = vmatpush3.bf16.msra.mxu1 %v2269_v33 }
 0x14c   : > { %709 = vmatpush1.bf16.msra.mxu0 %v2255_v28  ;;  %2034 = vmatprep.subr.bf16.mxu1 %v2270_v34 }
 0x14f   : > { %727 = vmatmul.mubr.bf16.vlgmr.msra.gmra.mrb[0].mxu0 %v1908_v30  ;;  %2035 = vmatpush3.bf16.msra.mxu1 %v2271_v35 }
 0x222   : > { %v728_v43 = vpop.f32.mrb[0].mxu0 }
 0x223   : > { %v729_v44 = vadd.f32 %v728_v43, %v601_v41  ;;  %v730_v45 = vpop.f32.mrb[1].mxu0 }
 0x224   : > { %v731_v46 = vadd.f32 %v730_v45, %v605_v42  ;;  %v732_v47 = vpop.f32.mrb[2].mxu0 }
 0x225   : > { %v733_v48 = vadd.f32 %v732_v47, %v601_v41  ;;  %v734_v49 = vpop.f32.mrb[3].mxu0  ;;  %v737_v51 = vmax.f32 %v729_v44, 0.0 }
 0x226   : > { %v735_v50 = vadd.f32 %v734_v49, %v605_v42  ;;  %v738_v53 = vmax.f32 %v731_v46, 0.0 }
 0x227   : > { %v739_v52 = vmax.f32 %v733_v48, 0.0 }
 0x228   : > { %v740_v54 = vmax.f32 %v735_v50, 0.0 }
 0x229   : > { %v741_v55 = vpack.c.bf16 %v739_v52, %v737_v51 }
 0x22a   : > { %v742_v56 = vpack.c.bf16 %v740_v54, %v738_v53 }
 0x22c   : > { %910 = vmatprep.mubr.bf16.mxu1 %v742_v56 }
 0x22d   : > { %911 = vmatmul.mubr.bf16.vlgmr.msra.gmra.mrb[0].mxu1 %v741_v55 }
 0x300   : > { %v2036_v57 = vpop.f32.mrb[0].mxu1 }
 0x301   : > { %v2037_v58 = vpop.f32.mrb[1].mxu1 }
 0x302   : > { %v2038_v60 = vadd.f32 %v2037_v58, %v2036_v57  ;;  %v2039_v61 = vpop.f32.mrb[2].mxu1 }
 0x303   : > { %v2040_v62 = vpop.f32.mrb[3].mxu1 }
 0x304   : > { %v2041_v63 = vadd.f32 %v2040_v62, %v2039_v61  ;;  %v913_v2 = vadd.f32 %v2038_v60, %v1925_v59 }
 0x306   : > { %v920_v3 = vsel %vm919_vm0, %v913_v2, -inf  ;;  %v916_v4 = vadd.f32 %v2041_v63, %v1925_v59 }
 0x307   : > { %921 = vmax.xlane.f32.xlu0 %v920_v3 }
 0x308   : > { %v923_v5 = vsel %vm919_vm0, %v916_v4, -inf }
 0x30b   : > { %924 = vmax.xlane.f32.xlu0 %v923_v5 }
 0x394   : > { %v922_v6 = vpop.xlane.xlu0 %921 }
 0x395   : > { %v926_v7 = vsub.f32 %v913_v2, %v922_v6 }
 0x397   : > { %v928_v8 = vmul.f32 1.442695, %v926_v7 }
 0x398   : > { %v925_v9 = vpop.xlane.xlu0 %924 }
 0x399   : > { %2272 = vpow2.f32 %v928_v8  ;;  %v927_v10 = vsub.f32 %v916_v4, %v925_v9 }
 0x39b   : > { %v930_v11 = vmul.f32 1.442695, %v927_v10 }
 0x39d   : > { %2274 = vpow2.f32 %v930_v11 }
 0x3a3   : > { %v2273_v12 = vpop.eup %2272 }
 0x3a4   : > { %v932_v13 = vsel %vm919_vm0, %v2273_v12, 0.0 }
 0x3a5   : > { %933 = vadd.xlane.f32.xlu1 %v932_v13 }
 0x3a7   : > { %v2275_v14 = vpop.eup %2274 }
 0x3a8   : > { %v935_v15 = vsel %vm919_vm0, %v2275_v14, 0.0 }
 0x3a9   : > { %936 = vadd.xlane.f32.xlu1 %v935_v15 }
 0x432   : > { %v934_v16 = vpop.xlane.xlu1 %933 }
 0x433   : > { %2276 = vrcp.f32 %v934_v16 }
 0x436   : > { %v937_v17 = vpop.xlane.xlu1 %936 }
 0x437   : > { %2278 = vrcp.f32 %v937_v17 }
 0x43d   : > { %v2277_v18 = vpop.eup %2276 }
 0x43e   : > { %v939_v19 = vmul.f32 %v2277_v18, %v2273_v12 }
 0x440   : > { %942 = vst.msk [vmem:[#allocation2] sm:$0xff] %vm919_vm0, %v939_v19  ;;  %v958_v22 = vsel %vm919_vm0, %v939_v19, 0.0 }
 0x441   : > { %v2279_v20 = vpop.eup %2278 }
 0x442   : > { %v941_v21 = vmul.f32 %v2279_v20, %v2275_v14 }
 0x444   : > { %943 = vst.msk [vmem:[#allocation2 + $0x8] sm:$0xff] %vm919_vm0, %v941_v21  ;;  %v959_v23 = vsel %vm919_vm0, %v941_v21, 0.0 }
 0x445   : > { %v960_v24 = vadd.f32 %v959_v23, %v958_v22 }
 0x447   : > { %v961_v25 = vrot.slane %v960_v24, 4 }
 0x449   : > { %v962_v26 = vadd.f32 %v961_v25, %v960_v24 }
 0x44b   : > { %v963_v27 = vrot.slane %v962_v26, 2 }
 0x44d   : > { %v964_v28 = vadd.f32 %v963_v27, %v962_v26 }
 0x44f   : > { %v965_v29 = vrot.slane %v964_v28, 1 }
 0x451   : > { %v966_v30 = vadd.f32 %v965_v29, %v964_v28 }
 0x453   : > { %v968_v31 = vsel %vm967_vm1, %v966_v30, 0.0 }
 0x454   : > { %969 = vst.msk [vmem:[#allocation19] sm:$0xff] %vm919_vm0, %v968_v31 }
 0x455 PF: > { %v2280_v32 = vld [vmem:[%s3171_s29 + $0x4] ss:$16 sps:$4 sm:$0xff]   ;;  %v2282_v33 = vld [vmem:[%s3171_s29 + $0xc] ss:$16 sps:$4 sm:$0xff]   ;;  %v2764_v34 = vmov 0   ;;  %v1942_v6 = vcombine.low %v3186_v0, %v3188_v1  ;;  %s3427_s10 = sld [smem:[#allocation29_spill]] }
 0x456   : > { %1222 = vmatprep.mubr.bf16.mxu0 %v2764_v34  ;;  %1265 = vmatprep.mubr.bf16.mxu1 %v2764_v34  ;;  %v2284_v35 = vld [vmem:[%s3171_s29] ss:$16 sps:$4 sm:$0xff]   ;;  %v2285_v36 = vld [vmem:[%s3171_s29 + $0x8] ss:$16 sps:$4 sm:$0xff]   ;;  %v2286_v37 = vld [vmem:[%s3171_s29 + $0x24] ss:$16 sps:$4 sm:$0xff]   ;;  %v1004_v34 = vlaneseq }
 0x457   : > { %1190 = vmatprep.subr.bf16.mxu0 %v2280_v32  ;;  %1233 = vmatprep.subr.bf16.mxu1 %v2282_v33  ;;  %v2288_v38 = vld [vmem:[%s3171_s29 + $0x2c] ss:$16 sps:$4 sm:$0xff]   ;;  %v2290_v39 = vld [vmem:[%s3171_s29 + $0x20] ss:$16 sps:$4 sm:$0xff]   ;;  %v2291_v40 = vld [vmem:[%s3171_s29 + $0x28] ss:$16 sps:$4 sm:$0xff]  }
 0x458   : > { %1191 = vmatpush1.bf16.msra.mxu0 %v2284_v35  ;;  %1234 = vmatpush1.bf16.msra.mxu1 %v2285_v36  ;;  %v2292_v41 = vld [vmem:[%s3171_s29 + $0x44] ss:$16 sps:$4 sm:$0xff]   ;;  %v2294_v42 = vld [vmem:[%s3171_s29 + $0x4c] ss:$16 sps:$4 sm:$0xff]   ;;  %v2296_v43 = vld [vmem:[%s3171_s29 + $0x40] ss:$16 sps:$4 sm:$0xff]  }
 0x459   : > { %1192 = vmatprep.subr.bf16.mxu0 %v2286_v37  ;;  %1235 = vmatprep.subr.bf16.mxu1 %v2288_v38  ;;  %v2297_v44 = vld [vmem:[%s3171_s29 + $0x48] ss:$16 sps:$4 sm:$0xff]   ;;  %v2298_v45 = vld [vmem:[%s3171_s29 + $0x64] ss:$16 sps:$4 sm:$0xff]   ;;  %v2300_v46 = vld [vmem:[%s3171_s29 + $0x6c] ss:$16 sps:$4 sm:$0xff]  }
 0x45a   : > { %v2302_v47 = vld [vmem:[%s3171_s29 + $0x60] ss:$16 sps:$4 sm:$0xff]   ;;  %v2303_v48 = vld [vmem:[%s3171_s29 + $0x68] ss:$16 sps:$4 sm:$0xff]   ;;  %v2304_v49 = vld [vmem:[%s3171_s29 + $0x84] ss:$16 sps:$4 sm:$0xff]  }
 0x45b   : > { %v2306_v50 = vld [vmem:[%s3171_s29 + $0x8c] ss:$16 sps:$4 sm:$0xff]   ;;  %v2308_v51 = vld [vmem:[%s3171_s29 + $0x80] ss:$16 sps:$4 sm:$0xff]   ;;  %v2309_v52 = vld [vmem:[%s3171_s29 + $0x88] ss:$16 sps:$4 sm:$0xff]   ;;  %v1635_v36 = vstv %s3427_s10 }
 0x45c   : > { %1193 = vmatpush1.bf16.msra.mxu0 %v2290_v39  ;;  %1236 = vmatpush1.bf16.msra.mxu1 %v2291_v40  ;;  %v2310_v53 = vld [vmem:[%s3171_s29 + $0xa4] ss:$16 sps:$4 sm:$0xff]   ;;  %v2312_v54 = vld [vmem:[%s3171_s29 + $0xac] ss:$16 sps:$4 sm:$0xff]   ;;  %v2314_v55 = vld [vmem:[%s3171_s29 + $0xa0] ss:$16 sps:$4 sm:$0xff]  }
 0x45d   : > { %1194 = vmatprep.subr.bf16.mxu0 %v2292_v41  ;;  %1237 = vmatprep.subr.bf16.mxu1 %v2294_v42  ;;  %v2315_v56 = vld [vmem:[%s3171_s29 + $0xa8] ss:$16 sps:$4 sm:$0xff]   ;;  %v2316_v57 = vld [vmem:[%s3171_s29 + $0xc4] ss:$16 sps:$4 sm:$0xff]   ;;  %v2318_v58 = vld [vmem:[%s3171_s29 + $0xcc] ss:$16 sps:$4 sm:$0xff]  }
 0x45e   : > { %v2320_v59 = vld [vmem:[%s3171_s29 + $0xc0] ss:$16 sps:$4 sm:$0xff]   ;;  %v2321_v60 = vld [vmem:[%s3171_s29 + $0xc8] ss:$16 sps:$4 sm:$0xff]   ;;  %v2322_v61 = vld [vmem:[%s3171_s29 + $0xe4] ss:$16 sps:$4 sm:$0xff]  }
 0x45f   : > { %v2324_v62 = vld [vmem:[%s3171_s29 + $0xec] ss:$16 sps:$4 sm:$0xff]   ;;  %v2326_v63 = vld [vmem:[%s3171_s29 + $0xe0] ss:$16 sps:$4 sm:$0xff]   ;;  %v2327_v2 = vld [vmem:[%s3171_s29 + $0xe8] ss:$16 sps:$4 sm:$0xff]  }
 0x460   : > { %1195 = vmatpush1.bf16.msra.mxu0 %v2296_v43  ;;  %1238 = vmatpush1.bf16.msra.mxu1 %v2297_v44  ;;  %v2328_v3 = vld [vmem:[%s3180_s9 + $0x40] sm:$0xff]   ;;  %v2332_v8 = vld [vmem:[%s3180_s9 + $0x48] sm:$0xff]   ;;  %v2336_v0 = vld [vmem:[%s3180_s9 + $0x50] sm:$0xff]   ;;  %v1634_v35 = vand.u32 127, %v1004_v34  ;;  %v2765_v39 = vmov 0.0   ;;  %vm1643_vm3 = vcmask 31744  }
 0x461   : > { %1196 = vmatprep.subr.bf16.mxu0 %v2298_v45  ;;  %1239 = vmatprep.subr.bf16.mxu1 %v2300_v46  ;;  %v2329_v4 = vld [vmem:[%s3180_s9 + $0xc0] sm:$0xff]   ;;  %v2333_v9 = vld [vmem:[%s3180_s9 + $0xc8] sm:$0xff]   ;;  %v2337_v1 = vld [vmem:[%s3180_s9 + $0xd0] sm:$0xff]   ;;  %v1005_v45 = vshrl.u32 %v1004_v34, 7 }
 0x462   : > { %v2330_v5 = vld [vmem:[%s3180_s9] sm:$0xff]   ;;  %v2334_v10 = vld [vmem:[%s3180_s9 + $0x8] sm:$0xff]   ;;  %v2338_v12 = vld [vmem:[%s3180_s9 + $0x10] sm:$0xff]   ;;  %vm1636_vm2 = vcmp.eq.s32.totalorder %v1634_v35, %v1635_v36 }
 0x463   : > { %v2331_v7 = vld [vmem:[%s3180_s9 + $0x80] sm:$0xff]   ;;  %v2335_v11 = vld [vmem:[%s3180_s9 + $0x88] sm:$0xff]   ;;  %v2339_v13 = vld [vmem:[%s3180_s9 + $0x90] sm:$0xff]   ;;  %v2008_v40 = vsel %vm1636_vm2, 1.0, %v2765_v39  ;;  %v1006_v46 = vsub.s32 0, %v1005_v45 }
 0x464   : > { %1197 = vmatpush1.bf16.msra.mxu0 %v2302_v47  ;;  %1240 = vmatpush1.bf16.msra.mxu1 %v2303_v48  ;;  %v2340_v14 = vld [vmem:[%s3180_s9 + $0x58] sm:$0xff]   ;;  %v2344_v18 = vld [vmem:[%s3180_s9 + $0x60] sm:$0xff]   ;;  %v2348_v22 = vld [vmem:[%s3180_s9 + $0x68] sm:$0xff]   ;;  %v1014_v47 = vsub.s32 2, %v1005_v45 }
 0x465   : > { %1198 = vmatprep.subr.bf16.mxu0 %v2304_v49  ;;  %1241 = vmatprep.subr.bf16.mxu1 %v2306_v50  ;;  %v2341_v15 = vld [vmem:[%s3180_s9 + $0xd8] sm:$0xff]   ;;  %v2345_v19 = vld [vmem:[%s3180_s9 + $0xe0] sm:$0xff]   ;;  %v2349_v23 = vld [vmem:[%s3180_s9 + $0xe8] sm:$0xff]   ;;  %v1010_v49 = vsub.s32 1, %v1005_v45  ;;  %v1018_v50 = vsub.s32 3, %v1005_v45 }
 0x466   : > { %v2342_v16 = vld [vmem:[%s3180_s9 + $0x18] sm:$0xff]   ;;  %v2346_v20 = vld [vmem:[%s3180_s9 + $0x20] sm:$0xff]   ;;  %v2350_v24 = vld [vmem:[%s3180_s9 + $0x28] sm:$0xff]  }
 0x467   : > { %v2343_v17 = vld [vmem:[%s3180_s9 + $0x98] sm:$0xff]   ;;  %v2347_v21 = vld [vmem:[%s3180_s9 + $0xa0] sm:$0xff]   ;;  %v2351_v25 = vld [vmem:[%s3180_s9 + $0xa8] sm:$0xff]  }
 0x468   : > { %1199 = vmatpush1.bf16.msra.mxu0 %v2308_v51  ;;  %1242 = vmatpush1.bf16.msra.mxu1 %v2309_v52  ;;  %v2352_v26 = vld [vmem:[%s3180_s9 + $0x70] sm:$0xff]   ;;  %v2356_v30 = vld [vmem:[%s3180_s9 + $0x78] sm:$0xff]   ;;  %v1640_v38 = vld [vmem:[#allocation2 + $0x8] sm:$0xff] }
 0x469   : > { %1200 = vmatprep.subr.bf16.mxu0 %v2310_v53  ;;  %1243 = vmatprep.subr.bf16.mxu1 %v2312_v54  ;;  %v2353_v27 = vld [vmem:[%s3180_s9 + $0xf0] sm:$0xff]   ;;  %v2357_v31 = vld [vmem:[%s3180_s9 + $0xf8] sm:$0xff]   ;;  %v1642_v42 = vmul.f32 %v2008_v40, %v1640_v38 }
 0x46a   : > { %v2354_v28 = vld [vmem:[%s3180_s9 + $0x30] sm:$0xff]   ;;  %v2358_v32 = vld [vmem:[%s3180_s9 + $0x38] sm:$0xff]  }
 0x46b   : > { %v2355_v29 = vld [vmem:[%s3180_s9 + $0xb0] sm:$0xff]   ;;  %v2359_v33 = vld [vmem:[%s3180_s9 + $0xb8] sm:$0xff]   ;;  %v1647_v44 = vsel %vm1643_vm3, %v1642_v42, 0.0 }
 0x46c   : > { %1201 = vmatpush1.bf16.msra.mxu0 %v2314_v55  ;;  %1244 = vmatpush1.bf16.msra.mxu1 %v2315_v56  ;;  %v1639_v37 = vld [vmem:[#allocation2] sm:$0xff] }
 0x46d   : > { %1202 = vmatprep.subr.bf16.mxu0 %v2316_v57  ;;  %1245 = vmatprep.subr.bf16.mxu1 %v2318_v58  ;;  %v1641_v41 = vmul.f32 %v2008_v40, %v1639_v37  ;;  %v1002_v48 = vld [vmem:[%s3178_s25] sm:$0xf] }
 0x46e   : > { %v1007_v51 = vrot.slane %v1002_v48, %v1006_v46  ;;  %v1015_v52 = vrot.slane %v1002_v48, %v1014_v47  ;;  %v1011_v53 = vrot.slane %v1002_v48, %v1010_v49  ;;  %v1019_v54 = vrot.slane %v1002_v48, %v1018_v50 }
 0x46f   : > { %v1644_v43 = vsel %vm1643_vm3, %v1641_v41, 0.0 }
 0x470   : > { %1203 = vmatpush1.bf16.msra.mxu0 %v2320_v59  ;;  %1246 = vmatpush1.bf16.msra.mxu1 %v2321_v60 }
 0x471   : > { %1204 = vmatprep.subr.bf16.mxu0 %v2322_v61  ;;  %1247 = vmatprep.subr.bf16.mxu1 %v2324_v62 }
 0x472   : > { %1645 = vadd.xlane.f32.xlu0 %v1644_v43 }
 0x474   : > { %1205 = vmatpush1.bf16.msra.mxu0 %v2326_v63  ;;  %1248 = vmatpush1.bf16.msra.mxu1 %v2327_v2 }
 0x475   : > { %2042 = vmatprep.subr.bf16.mxu0 %v2328_v3  ;;  %2064 = vmatprep.subr.bf16.mxu1 %v2329_v4 }
 0x476   : > { %1648 = vadd.xlane.f32.xlu0 %v1647_v44 }
 0x477   : > { %1223 = vmatmul.mubr.bf16.vlgmr.msra.gmra.mrb[0].mxu0 %v1942_v6  ;;  %1266 = vmatmul.mubr.bf16.vlgmr.msra.gmra.mrb[0].mxu1 %v1942_v6 }
 0x478   : > { %2043 = vmatpush3.bf16.msra.mxu0 %v2330_v5  ;;  %2065 = vmatpush3.bf16.msra.mxu1 %v2331_v7 }
 0x479   : > { %2044 = vmatprep.subr.bf16.mxu0 %v2332_v8  ;;  %2066 = vmatprep.subr.bf16.mxu1 %v2333_v9 }
 0x47c   : > { %2045 = vmatpush3.bf16.msra.mxu0 %v2334_v10  ;;  %2067 = vmatpush3.bf16.msra.mxu1 %v2335_v11 }
 0x47d   : > { %2046 = vmatprep.subr.bf16.mxu0 %v2336_v0  ;;  %2068 = vmatprep.subr.bf16.mxu1 %v2337_v1 }
 0x480   : > { %2047 = vmatpush3.bf16.msra.mxu0 %v2338_v12  ;;  %2069 = vmatpush3.bf16.msra.mxu1 %v2339_v13 }
 0x481   : > { %2048 = vmatprep.subr.bf16.mxu0 %v2340_v14  ;;  %2070 = vmatprep.subr.bf16.mxu1 %v2341_v15 }
 0x484   : > { %2049 = vmatpush3.bf16.msra.mxu0 %v2342_v16  ;;  %2071 = vmatpush3.bf16.msra.mxu1 %v2343_v17 }
 0x485   : > { %2050 = vmatprep.subr.bf16.mxu0 %v2344_v18  ;;  %2072 = vmatprep.subr.bf16.mxu1 %v2345_v19 }
 0x488   : > { %2051 = vmatpush3.bf16.msra.mxu0 %v2346_v20  ;;  %2073 = vmatpush3.bf16.msra.mxu1 %v2347_v21 }
 0x489   : > { %2052 = vmatprep.subr.bf16.mxu0 %v2348_v22  ;;  %2074 = vmatprep.subr.bf16.mxu1 %v2349_v23  ;;  %v1975_v23 = vld [vmem:[%s524_s11] ss:$0 sm:$0xff] }
 0x48c   : > { %2053 = vmatpush3.bf16.msra.mxu0 %v2350_v24  ;;  %2075 = vmatpush3.bf16.msra.mxu1 %v2351_v25 }
 0x48d   : > { %2054 = vmatprep.subr.bf16.mxu0 %v2352_v26  ;;  %2076 = vmatprep.subr.bf16.mxu1 %v2353_v27 }
 0x490   : > { %2055 = vmatpush3.bf16.msra.mxu0 %v2354_v28  ;;  %2077 = vmatpush3.bf16.msra.mxu1 %v2355_v29 }
 0x491   : > { %2056 = vmatprep.subr.bf16.mxu0 %v2356_v30  ;;  %2078 = vmatprep.subr.bf16.mxu1 %v2357_v31 }
 0x494   : > { %2057 = vmatpush3.bf16.msra.mxu0 %v2358_v32  ;;  %2079 = vmatpush3.bf16.msra.mxu1 %v2359_v33 }
 0x4ff   : > { %v1646_v19 = vpop.xlane.xlu0 %1645 }
 0x503   : > { %v1649_v20 = vpop.xlane.xlu0 %1648 }
 0x54a   : > { %v1224_v55 = vpop.f32.mrb[0].mxu0  ;;  %v1267_v56 = vpop.f32.mrb[0].mxu1 }
 0x54b   : > { %v1225_v57 = vadd.f32 %v1224_v55, %v1007_v51  ;;  %v1268_v58 = vadd.f32 %v1267_v56, %v1015_v52  ;;  %v1226_v59 = vpop.f32.mrb[1].mxu0  ;;  %v1269_v60 = vpop.f32.mrb[1].mxu1 }
 0x54c   : > { %v1227_v61 = vadd.f32 %v1226_v59, %v1011_v53  ;;  %v1270_v62 = vadd.f32 %v1269_v60, %v1019_v54  ;;  %v1228_v63 = vpop.f32.mrb[2].mxu0  ;;  %v1271_v2 = vpop.f32.mrb[2].mxu1 }
 0x54d   : > { %v1278_v3 = vmax.f32 %v1268_v58, 0.0  ;;  %v1229_v4 = vadd.f32 %v1228_v63, %v1007_v51  ;;  %v1272_v5 = vadd.f32 %v1271_v2, %v1015_v52  ;;  %v1230_v6 = vpop.f32.mrb[3].mxu0  ;;  %v1273_v7 = vpop.f32.mrb[3].mxu1  ;;  %v1276_v11 = vmax.f32 %v1225_v57, 0.0 }
 0x54e   : > { %v1279_v8 = vmax.f32 %v1270_v62, 0.0  ;;  %v1231_v9 = vadd.f32 %v1230_v6, %v1011_v53  ;;  %v1274_v10 = vadd.f32 %v1273_v7, %v1019_v54  ;;  %v1277_v12 = vmax.f32 %v1227_v61, 0.0 }
 0x54f   : > { %v1280_v0 = vmax.f32 %v1229_v4, 0.0  ;;  %v1282_v1 = vmax.f32 %v1272_v5, 0.0 }
 0x550   : > { %v1281_v13 = vmax.f32 %v1231_v9, 0.0  ;;  %v1283_v14 = vmax.f32 %v1274_v10, 0.0 }
 0x551   : > { %v1284_v15 = vpack.c.bf16 %v1280_v0, %v1276_v11  ;;  %v1286_v16 = vpack.c.bf16 %v1282_v1, %v1278_v3 }
 0x552   : > { %v1285_v17 = vpack.c.bf16 %v1281_v13, %v1277_v12  ;;  %v1287_v18 = vpack.c.bf16 %v1283_v14, %v1279_v8 }
 0x554   : > { %1583 = vmatprep.mubr.bf16.mxu0 %v1285_v17  ;;  %1624 = vmatprep.mubr.bf16.mxu1 %v1287_v18 }
 0x555   : > { %1584 = vmatmul.mubr.bf16.vlgmr.msra.gmra.mrb[4].mxu0 %v1284_v15  ;;  %1625 = vmatmul.mubr.bf16.vlgmr.msra.gmra.mrb[4].mxu1 %v1286_v16 }
 0x628   : > { %v2058_v21 = vpop.f32.mrb[4].mxu0  ;;  %v2080_v22 = vpop.f32.mrb[4].mxu1 }
 0x629   : > { %v2059_v24 = vpop.f32.mrb[5].mxu0  ;;  %v2081_v25 = vpop.f32.mrb[5].mxu1 }
 0x62a   : > { %v2060_v26 = vadd.f32 %v2059_v24, %v2058_v21  ;;  %v2082_v27 = vadd.f32 %v2081_v25, %v2080_v22  ;;  %v2061_v28 = vpop.f32.mrb[6].mxu0  ;;  %v2083_v29 = vpop.f32.mrb[6].mxu1  ;;  %1652 = sbr.rel (%p1907_p6) target bundleno = 1589 (0x635), region = 100 }
 0x62b   : > { %v2062_v30 = vpop.f32.mrb[7].mxu0  ;;  %v2084_v31 = vpop.f32.mrb[7].mxu1 }
 0x62c   : > { %v1586_v32 = vadd.f32 %v2060_v26, %v1975_v23  ;;  %v2063_v33 = vadd.f32 %v2062_v30, %v2061_v28  ;;  %v2085_v34 = vadd.f32 %v2084_v31, %v2083_v29 }
 0x62e   : > { %v1627_v35 = vadd.f32 %v2082_v27, %v1586_v32  ;;  %v1589_v36 = vadd.f32 %v2063_v33, %v1975_v23 }
 0x630   : > { %v1630_v37 = vadd.f32 %v2085_v34, %v1589_v36  ;;  %v1653_v38 = vmul.f32 (!%p1907_p6), %v1646_v19, %v1627_v35 }
 0x632   : > { %v1654_v39 = vmul.f32 %v1649_v20, %v1630_v37  ;;  %1655 = vst [vmem:[#allocation18] sm:$0xff] %v1653_v38 }
 0x634   : > { %1656 = vst [vmem:[#allocation18 + $0x8] sm:$0xff] %v1654_v39 }
 0x635 PF: > { %s3428_s23 = sld [smem:[#allocation29_spill]] }
 0x63b   : > { %p2010_p5 = scmp.eq.s32.totalorder %s3428_s23, 0 }
 0x63c   : > { %v1661_v40 = vld [vmem:[#allocation18] sm:$0xff] (!%p2010_p5)  ;;  %v1663_v41 = vmul.f32 (!%p2010_p5), %v1646_v19, %v1627_v35  ;;  %v1662_v42 = vld [vmem:[#allocation18 + $0x8] sm:$0xff] (!%p2010_p5)  ;;  %v1664_v43 = vmul.f32 (!%p2010_p5), %v1649_v20, %v1630_v37 }
 0x63d   : > { %1660 = sbr.rel (%p2010_p5) target bundleno = 1604 (0x644), region = 104 }
 0x63e   : > { %v1665_v44 = vadd.f32 (!%p2010_p5), %v1663_v41, %v1661_v40  ;;  %v1666_v45 = vadd.f32 (!%p2010_p5), %v1664_v43, %v1662_v42 }
 0x640   : > { %1667 = vst [vmem:[#allocation18] sm:$0xff] (!%p2010_p5), %v1665_v44  ;;  %1668 = vst [vmem:[#allocation18 + $0x8] sm:$0xff] (!%p2010_p5), %v1666_v45 }
 0x644 PF: > { %p2162_p9 = scmp.eq.s32.totalorder %s2856_s21, 3  ;;  %s2766_s20 = smov [#allocation18]  }
 0x645   : > { %s1678_s1 = sshll.u32 %s2766_s20, 4  ;;  %s1679_s1 = int_to_ptr.vmem [resolvable:$true] %s1678_s1 }
 0x646   : > { %s2620_s18 = scalar_lea.vmem %s1679_s1, 256  ;;  %p2627_p12 = scmp.lt.s32.totalorder %s1679_s1, %s1679_s1 }
 0x647   : > { %p2621_p10 = scmp.ne.s32.totalorder %s1679_s1, %s2620_s18  ;;  %p2628_p11 = scmp.lt.s32.totalorder %s2620_s18, %s2620_s18 }
 0x649   : > { %p2622_p0 = pnand %p2621_p10, %p2162_p9  ;;  %p2629_p1 = por %p2628_p11, %p2627_p12 }
 0x64b   : > { %p2623_p2 = pneg %p2622_p0 }
 0x64d   : > { %p2630_p3 = pnand %p2629_p1, %p2623_p2 }
 0x64f   : > { %2633 = shalt.err (!%p2630_p3)
}
 0x650   : > { %s3429_s19 = sld [smem:[#allocation38_spill]] }
 0x656   : > { %s2634_s16 = scalar_lea.hbm %s3429_s19, 256 }
 0x657   : > { %p2635_p8 = scmp.ne.s32.totalorder %s3429_s19, %s2634_s16  ;;  %p2640_p13 = scmp.lt.u32.totalorder %s2634_s16, %s3429_s19 }
 0x659   : > { %p2636_p7 = pnand %p2635_p8, %p2162_p9 }
 0x65b   : > { %p2637_p4 = pneg %p2636_p7 }
 0x65d   : > { %p2642_p6 = pnand %p2640_p13, %p2637_p4 }
 0x65f   : > { %2645 = shalt.err (!%p2642_p6)
}
 0x660   : > { %s2767_s12 = smov 128   ;;  %s2768_s26 = smov 8  }
 0x661   : > { %2115 = dma.vmem_to_hbm [thread:$0]  (%p2162_p9), %s1679_s1, 256, %s3429_s19, [#allocation5], %s2767_s12, %s2767_s12, %s2768_s26  }
 0x662   : > { %s2769_s30 = smov [#allocation19]  }
 0x663   : > { %s1694_s25 = sshll.u32 %s2769_s30, 4  ;;  %s1695_s25 = int_to_ptr.vmem [resolvable:$true] %s1694_s25 }
 0x664   : > { %s2646_s3 = scalar_lea.vmem %s1695_s25, 128  ;;  %p2653_p2 = scmp.lt.s32.totalorder %s1695_s25, %s1695_s25 }
 0x665   : > { %p2647_p5 = scmp.ne.s32.totalorder %s1695_s25, %s2646_s3  ;;  %p2654_p12 = scmp.lt.s32.totalorder %s2646_s3, %s2646_s3 }
 0x667   : > { %p2648_p10 = pnand %p2647_p5, %p2162_p9  ;;  %p2655_p11 = por %p2654_p12, %p2653_p2 }
 0x669   : > { %p2649_p0 = pneg %p2648_p10 }
 0x66b   : > { %p2656_p1 = pnand %p2655_p11, %p2649_p0 }
 0x66d   : > { %2659 = shalt.err (!%p2656_p1)
}
 0x66e   : > { %s3430_s28 = sld [smem:[#allocation39_spill]] }
 0x674   : > { %s2660_s10 = scalar_lea.hbm %s3430_s28, 128 }
 0x675   : > { %p2661_p3 = scmp.ne.s32.totalorder %s3430_s28, %s2660_s10  ;;  %p2666_p4 = scmp.lt.u32.totalorder %s2660_s10, %s3430_s28 }
 0x677   : > { %p2662_p8 = pnand %p2661_p3, %p2162_p9 }
 0x679   : > { %p2663_p7 = pneg %p2662_p8 }
 0x67b   : > { %p2668_p13 = pnand %p2666_p4, %p2663_p7 }
 0x67d   : > { %2671 = shalt.err (!%p2668_p13)
}
 0x67e   : > { %2117 = dma.vmem_to_hbm [thread:$0]  (%p2162_p9), %s1695_s25, 128, %s3430_s28, [#allocation20]  }
 0x67f   : > { %2717 = dma.done.wait (%p2162_p9), [#allocation5], 256  }
 0x680   : > { %2719 = vsyncadd (%p2162_p9), [#allocation5], 4294967040 }
 0x681   : > { %2721 = dma.done.wait (%p2162_p9), [#allocation20], 128  }
 0x682   : > { %2723 = vsyncadd (%p2162_p9), [#allocation20], 4294967168 }
 0x683 PF: > { %s3431_s16 = sld [smem:[#allocation30_spill]]  ;;  %s3432_s24 = sld [smem:[#allocation28_spill]] }
 0x684   : > { %s3433_s15 = sld [smem:[#allocation33_spill]]  ;;  %s3434_s27 = sld [smem:[#allocation31_spill]] }
 0x685   : > { %s3435_s13 = smov %s2730_s14 }
 0x689   : > { %s32_s18 = sadd.s32 1, %s3431_s16   ;;  %s3436_s14 = smov %s3432_s24 }
 0x68a   : > { %p29_p6 = scmp.ge.s32.totalorder %s32_s18, 6   ;;  %s3437_s16 = smov %s2742_s17 }
 0x68b   : > { %s3438_s17 = smov %s3434_s27 }
 0x68c   :  { %31 = sbr.rel (!%p29_p6) target bundleno = 18 (0x12), region = 172 }
 0x693   :  { %1711 = vsyncpa [#allocation4], 1 }
 0x694   :  { %1713 = vsyncpa [#allocation4 + $0x1], 1 }
 0x695   :  { %1714 = vsyncpa [#allocation7], 1 }
 0x696   :  { %1715 = vsyncpa [#allocation10], 1 }
 0x697   :  { %1716 = vsyncpa [#allocation13], 1 }
 0x698   :  { %1718 = vsyncpa [#allocation13 + $0x1], 1 }
 0x699   :  { %1719 = vsyncpa [#allocation16], 1 }
 0x69a   :  { %1721 = vsyncpa [#allocation16 + $0x1], 1 }
 0x69b   :  { %1722 = vsyncpa [#allocation5], 1 }
 0x69c   :  { %1724 = vsyncpa [#allocation5 + $0x1], 1 }
 0x69d   :  { %1725 = vsyncpa [#allocation20], 1 }

</bundles_post_ra>
